<compile_context>
chip_gen: v7x
topology: tpu7x:2x2x1
jax: 0.10.0
libtpu: 0.0.40
codegen_flags: <defaults>
</compile_context>

<pallas_src>
import jax
import jax.numpy as jnp
from jax.experimental import pallas as pl
from jax.experimental.pallas import tpu as pltpu


# --------------------------------------------------------------------------- #
# Kernel
# --------------------------------------------------------------------------- #
def iaff_kernel(x_ref, r_ref, w1_ref, b1_ref, w2_ref, b2_ref, o_ref):
    nb, hw, cp = x_ref.shape            # (batch chunk, spatial, padded channels)
    two_ip = w1_ref.shape[2]            # 2 * lane-padded bottleneck width
    ip = two_ip // 2
    rows = nb * hw
    inv_hw = jnp.float32(1.0 / hw)

    x = x_ref[...].reshape(rows, cp)    # bf16
    res = r_ref[...].reshape(rows, cp)  # bf16
    d = x - res                         # bf16, reused by both blends

    def attention(inp_bf, w1, b1, w2, b2):
        """Fused local+global attention -> sigmoid gate (rows, cp) bf16.

        w1 = [w_local | 0 | w_global | 0] (cp, 2*ip) bf16, b1 likewise.
        w2 = stacked [[w2_local padded]; [w2_global padded]] (2*ip, cp) bf16,
        b2 = b2_local + b2_global (1, cp) f32.
        """
        # one MXU call covers BOTH first-layer 1x1 convs (f32 accumulate)
        pre = jnp.dot(inp_bf, w1, preferred_element_type=jnp.float32) + b1   # (rows, 2*ip)
        h_loc = jnp.maximum(pre[:, :ip], 0.0)                                # lane-aligned
        # global branch: conv(mean(x)) == mean(conv(x)) (both linear, incl. bias),
        # so pool the global-half pre-activations per image instead of a 2nd matmul.
        g_sum = jnp.sum(pre[:, ip:].reshape(nb, hw, ip), axis=1)             # (nb, ip) f32
        h_glb = jnp.maximum(g_sum * inv_hw, 0.0)                             # (nb, ip)
        h_glb_b = jnp.broadcast_to(h_glb.reshape(nb, 1, ip),
                                   (nb, hw, ip)).reshape(rows, ip)
        # fused second layer: one matmul gives xl + xg (biases pre-summed in b2)
        h = jnp.concatenate([h_loc, h_glb_b], axis=1).astype(jnp.bfloat16)   # (rows, 2*ip)
        gate = jnp.dot(h, w2, preferred_element_type=jnp.float32) + b2       # (rows, cp)
        # sigmoid: exp on EUP, divide replaced by EUP approx reciprocal
        wei = pl.reciprocal(1.0 + jnp.exp(-gate), approx=True)
        return wei.astype(jnp.bfloat16)

    # pass 1
    wei = attention(x + res, w1_ref[0], b1_ref[0], w2_ref[0], b2_ref[0])
    xi = res + d * wei                  # == x*wei + res*(1-wei)
    # pass 2: forward() reuses global_att (not global_att2) -- reproduced exactly
    wei2 = attention(xi, w1_ref[1], b1_ref[1], w2_ref[1], b2_ref[1])
    o_ref[...] = (res + d * wei2).reshape(nb, hw, cp)     # bf16 store


# --------------------------------------------------------------------------- #
# Sizing helpers
# --------------------------------------------------------------------------- #
def _vmem_budget_bytes():
    """Per-generation scoped-VMEM budget: ~75% of physical, capped at 100 MiB.
    128 MiB chips (v5e/v6e) -> 96 MiB; 64 MiB chips (v7x) -> 48 MiB."""
    cap = 64 * 1024 * 1024
    try:
        cap = int(pltpu.get_tpu_info().vmem_capacity_bytes)
    except Exception:
        pass
    return min((cap * 3) // 4, 100 * 1024 * 1024)


def _per_image_vmem_bytes(hw, cp, ip):
    """Conservative per-image working-set estimate for NB selection."""
    bf16, f32 = 2, 4
    pipeline = 3 * 2 * hw * cp * bf16                       # x, res, out double-buffered
    temps = hw * (5 * cp * bf16 + cp * f32 + 2 * ip * (f32 + bf16))
    return pipeline + temps


def _prefer_grid_split():
    """>=2 grid steps only pays off on chips with 2 TensorCores per device
    (v4/v5p megacore, v7x); on single-TC v5e/v6e a split is a pure serial loop."""
    try:
        kind = jax.devices()[0].device_kind.lower()
    except Exception:
        return True
    single_tc = ("v5e", "v5 lite", "v5lite", "v6e", "v6 lite", "v6lite")
    return not any(t in kind for t in single_tc)


def _pick_batch_block(n, per_image_bytes, budget_bytes, prefer_split):
    """Largest divisor of n whose working set fits the VMEM budget; on 2-TC chips
    keep >= 2 grid steps when possible so both TensorCores get work."""
    divisors = [d for d in range(1, n + 1) if n % d == 0]
    fitting = [d for d in divisors if d * per_image_bytes <= budget_bytes] or [1]
    nb = max(fitting)
    if prefer_split and n >= 2 and nb == n:
        smaller = [d for d in fitting if d <= -(-n // 2)]
        if smaller:
            nb = max(smaller)
    return nb


# --------------------------------------------------------------------------- #
# Parameter packing (hoisted out of the per-call path; run once at model init)
# --------------------------------------------------------------------------- #
def pack_iaff_params(params, channels):
    """12 folded conv+bn arrays -> 4 packed, lane-padded, MXU-ready arrays."""
    (wl1, bl1, wl2, bl2, wg1, bg1, wg2, bg2, wl21, bl21, wl22, bl22) = params
    C = channels
    inter = wl1.shape[1]
    CP = max(128, -(-C // 128) * 128)          # lane-dense padded channel count
    IP = max(128, -(-inter // 128) * 128)      # lane-padded bottleneck width

    def pack_w1(w_loc, w_glb):                 # (C, inter) each -> (CP, 2*IP)
        out = jnp.zeros((CP, 2 * IP), jnp.float32)
        out = out.at[:C, :inter].set(w_loc)
        out = out.at[:C, IP:IP + inter].set(w_glb)
        return out

    def pack_b1(b_loc, b_glb):                 # (1, inter) each -> (1, 2*IP)
        out = jnp.zeros((1, 2 * IP), jnp.float32)
        out = out.at[:, :inter].set(b_loc)
        out = out.at[:, IP:IP + inter].set(b_glb)
        return out

    def pack_w2(w_loc, w_glb):                 # (inter, C) each -> (2*IP, CP)
        out = jnp.zeros((2 * IP, CP), jnp.float32)
        out = out.at[:inter, :C].set(w_loc)
        out = out.at[IP:IP + inter, :C].set(w_glb)
        return out

    def pack_b2(b_loc, b_glb):                 # (1, C) each -> (1, CP), pre-summed
        out = jnp.zeros((1, CP), jnp.float32)
        return out.at[:, :C].set(b_loc + b_glb)

    # pass 2 reuses global_att's parameters (PyTorch forward() quirk)
    w1 = jnp.stack([pack_w1(wl1, wg1), pack_w1(wl21, wg1)]).astype(jnp.bfloat16)
    b1 = jnp.stack([pack_b1(bl1, bg1), pack_b1(bl21, bg1)]).astype(jnp.float32)
    w2 = jnp.stack([pack_w2(wl2, wg2), pack_w2(wl22, wg2)]).astype(jnp.bfloat16)
    b2 = jnp.stack([pack_b2(bl2, bg2), pack_b2(bl22, bg2)]).astype(jnp.float32)
    return {"w1": w1, "b1": b1, "w2": w2, "b2": b2, "C": C, "CP": CP, "IP": IP}


# --------------------------------------------------------------------------- #
# Forward wrapper
# --------------------------------------------------------------------------- #
def iaff_forward(x_nchw, res_nchw, packed):
    """x_nchw, res_nchw: (N, C, H, W). Returns (N, C, H, W) bfloat16."""
    N, C, H, W = x_nchw.shape
    assert C == packed["C"]
    HW = H * W
    CP, IP = packed["CP"], packed["IP"]
    w1, b1, w2, b2 = packed["w1"], packed["b1"], packed["w2"], packed["b2"]

    # NHWC flatten, channel pad to lane width, bf16 cast
    def prep(t):
        t = jnp.transpose(t, (0, 2, 3, 1)).reshape(N, HW, C)
        if CP > C:
            t = jnp.pad(t, ((0, 0), (0, 0), (0, CP - C)))
        return t.astype(jnp.bfloat16)

    x = prep(x_nchw)
    r = prep(res_nchw)

    budget = _vmem_budget_bytes()
    param_bytes = 2 * sum(int(a.size) * a.dtype.itemsize for a in (w1, b1, w2, b2))
    per_image = _per_image_vmem_bytes(HW, CP, IP)
    NB = _pick_batch_block(N, per_image, max(budget - param_bytes, per_image),
                           _prefer_grid_split())
    grid = (N // NB,)

    data_spec = lambda: pl.BlockSpec((NB, HW, CP), lambda g: (g, 0, 0))
    full_spec = lambda a: pl.BlockSpec(a.shape, lambda g, _nd=a.ndim: (0,) * _nd)

    out = pl.pallas_call(
        iaff_kernel,
        out_shape=jax.ShapeDtypeStruct((N, HW, CP), jnp.bfloat16),
        grid=grid,
        in_specs=[data_spec(), data_spec(),
                  full_spec(w1), full_spec(b1), full_spec(w2), full_spec(b2)],
        out_specs=data_spec(),
        compiler_params=pltpu.CompilerParams(
            dimension_semantics=("parallel",),
            vmem_limit_bytes=int(budget),
        ),
    )(x, r, w1, b1, w2, b2)

    out = out[:, :, :C].reshape(N, H, W, C)          # drop channel padding (bf16)
    return jnp.transpose(out, (0, 3, 1, 2))


# --------------------------------------------------------------------------- #
# Pure-JAX f32 reference of the PyTorch forward (folded conv+bn)
# --------------------------------------------------------------------------- #
def iaff_reference(x_nchw, res_nchw, params):
    (wl1, bl1, wl2, bl2, wg1, bg1, wg2, bg2, wl21, bl21, wl22, bl22) = params
    N, C, H, W = x_nchw.shape
    x = jnp.transpose(x_nchw, (0, 2, 3, 1)).reshape(N, H * W, C)
    r = jnp.transpose(res_nchw, (0, 2, 3, 1)).reshape(N, H * W, C)

    def local(inp, w1, b1, w2, b2):
        return jnp.maximum(inp @ w1 + b1, 0.0) @ w2 + b2

    def glob(inp, w1, b1, w2, b2):
        g = jnp.mean(inp, axis=1, keepdims=True)
        return jnp.maximum(g @ w1 + b1, 0.0) @ w2 + b2

    xa = x + r
    wei = jax.nn.sigmoid(local(xa, wl1, bl1, wl2, bl2) + glob(xa, wg1, bg1, wg2, bg2))
    xi = x * wei + r * (1.0 - wei)
    wei2 = jax.nn.sigmoid(local(xi, wl21, bl21, wl22, bl22) + glob(xi, wg1, bg1, wg2, bg2))
    xo = x * wei2 + r * (1.0 - wei2)
    return jnp.transpose(xo.reshape(N, H, W, C), (0, 3, 1, 2))


def init_conv_bn(key, cin, cout, eps=1e-5):
    """kaiming_normal(fan_out, relu) conv weight, default uniform conv bias,
    BN(gamma=1, beta=0, mean=0, var=1) folded in (inference mode)."""
    kw, kb = jax.random.split(key)
    std = (2.0 / cout) ** 0.5                      # fan_out = cout for 1x1 conv
    w = jax.random.normal(kw, (cin, cout), jnp.float32) * std
    bound = 1.0 / (cin ** 0.5)
    b = jax.random.uniform(kb, (cout,), jnp.float32, minval=-bound, maxval=bound)
    bn_scale = 1.0 / jnp.sqrt(1.0 + eps)           # gamma / sqrt(var + eps)
    return w * bn_scale, (b * bn_scale).reshape(1, cout)


if __name__ == "__main__":
    channels, r = 64, 4
    inter = channels // r
    N, H, W = 2, 8, 8

    key = jax.random.PRNGKey(0)
    keys = jax.random.split(key, 8)

    wl1, bl1 = init_conv_bn(keys[0], channels, inter)      # local_att
    wl2, bl2 = init_conv_bn(keys[1], inter, channels)
    wg1, bg1 = init_conv_bn(keys[2], channels, inter)      # global_att
    wg2, bg2 = init_conv_bn(keys[3], inter, channels)
    wl21, bl21 = init_conv_bn(keys[4], channels, inter)    # local_att2
    wl22, bl22 = init_conv_bn(keys[5], inter, channels)
    # global_att2 params exist in __init__ but are never used by forward(); omitted.

    params = (wl1, bl1, wl2, bl2, wg1, bg1, wg2, bg2, wl21, bl21, wl22, bl22)
    packed = pack_iaff_params(params, channels)            # hoisted: once at init

    x = jax.random.normal(keys[6], (N, channels, H, W), jnp.float32)
    residual = jax.random.normal(keys[7], (N, channels, H, W), jnp.float32)

    out = iaff_forward(x, residual, packed)
    jax.block_until_ready(out)
    assert out.shape == (N, channels, H, W)
    assert out.dtype == jnp.bfloat16

    # loose tolerance: matmul inputs, elementwise chain and output are bf16
    ref = iaff_reference(x, residual, params)
    max_err = float(jnp.max(jnp.abs(out.astype(jnp.float32) - ref)))
    assert max_err < 0.3, f"max abs error {max_err} vs f32 reference"

    print("KERNEL_OK")
</pallas_src>

<mosaic_0001>
module attributes {stable_mosaic.version = 11 : i64} {
  func.func @iaff_kernel(%arg0: i32, %arg1: memref<1x64x128xbf16, #tpu.memory_space<vmem>>, %arg2: memref<1x64x128xbf16, #tpu.memory_space<vmem>>, %arg3: memref<2x128x256xbf16, #tpu.memory_space<vmem>>, %arg4: memref<2x1x256xf32, #tpu.memory_space<vmem>>, %arg5: memref<2x256x128xbf16, #tpu.memory_space<vmem>>, %arg6: memref<2x1x128xf32, #tpu.memory_space<vmem>>, %arg7: memref<1x64x128xbf16, #tpu.memory_space<vmem>>) attributes {dimension_semantics = [#tpu.dimension_semantics<parallel>], iteration_bounds = array<i64: 2>, scalar_prefetch = 0 : i64, scratch_operands = 0 : i64, tpu.core_type = #tpu.core_type<tc>, window_params = [{transform_indices = @transform_0, window_bounds = array<i64: 1, 64, 128>}, {transform_indices = @transform_1, window_bounds = array<i64: 1, 64, 128>}, {pipeline_mode = #tpu.pipeline_mode<synchronous>, transform_indices = @transform_2, window_bounds = array<i64: 2, 128, 256>}, {pipeline_mode = #tpu.pipeline_mode<synchronous>, transform_indices = @transform_3, window_bounds = array<i64: 2, 1, 256>}, {pipeline_mode = #tpu.pipeline_mode<synchronous>, transform_indices = @transform_4, window_bounds = array<i64: 2, 256, 128>}, {pipeline_mode = #tpu.pipeline_mode<synchronous>, transform_indices = @transform_5, window_bounds = array<i64: 2, 1, 128>}, {transform_indices = @transform_6, window_bounds = array<i64: 1, 64, 128>}]} {
    %c0 = arith.constant 0 : index
    %c0_0 = arith.constant 0 : index
    %c0_1 = arith.constant 0 : index
    %0 = vector.load %arg1[%c0, %c0_0, %c0_1] : memref<1x64x128xbf16, #tpu.memory_space<vmem>>, vector<1x64x128xbf16>
    %1 = vector.shape_cast %0 : vector<1x64x128xbf16> to vector<64x128xbf16>
    %c0_2 = arith.constant 0 : index
    %c0_3 = arith.constant 0 : index
    %c0_4 = arith.constant 0 : index
    %2 = vector.load %arg2[%c0_2, %c0_3, %c0_4] : memref<1x64x128xbf16, #tpu.memory_space<vmem>>, vector<1x64x128xbf16>
    %3 = vector.shape_cast %2 : vector<1x64x128xbf16> to vector<64x128xbf16>
    %4 = arith.subf %1, %3 : vector<64x128xbf16>
    %5 = arith.addf %1, %3 : vector<64x128xbf16>
    %c0_5 = arith.constant 0 : index
    %c0_6 = arith.constant 0 : index
    %c0_7 = arith.constant 0 : index
    %6 = vector.load %arg3[%c0_5, %c0_6, %c0_7] : memref<2x128x256xbf16, #tpu.memory_space<vmem>>, vector<1x128x256xbf16>
    %7 = vector.shape_cast %6 : vector<1x128x256xbf16> to vector<128x256xbf16>
    %c0_8 = arith.constant 0 : index
    %c0_9 = arith.constant 0 : index
    %c0_10 = arith.constant 0 : index
    %8 = vector.load %arg4[%c0_8, %c0_9, %c0_10] : memref<2x1x256xf32, #tpu.memory_space<vmem>>, vector<1x1x256xf32>
    %9 = vector.shape_cast %8 : vector<1x1x256xf32> to vector<1x256xf32>
    %c0_11 = arith.constant 0 : index
    %c0_12 = arith.constant 0 : index
    %c0_13 = arith.constant 0 : index
    %10 = vector.load %arg5[%c0_11, %c0_12, %c0_13] : memref<2x256x128xbf16, #tpu.memory_space<vmem>>, vector<1x256x128xbf16>
    %11 = vector.shape_cast %10 : vector<1x256x128xbf16> to vector<256x128xbf16>
    %c0_14 = arith.constant 0 : index
    %c0_15 = arith.constant 0 : index
    %c0_16 = arith.constant 0 : index
    %12 = vector.load %arg6[%c0_14, %c0_15, %c0_16] : memref<2x1x128xf32, #tpu.memory_space<vmem>>, vector<1x1x128xf32>
    %13 = vector.shape_cast %12 : vector<1x1x128xf32> to vector<1x128xf32>
    %cst = arith.constant dense<0.000000e+00> : vector<64x256xf32>
    %14 = tpu.matmul %5, %7, %cst {dimension_numbers = #tpu.dot_dimension_numbers<[1], [0], [0], [1], [0, 0, 1, 1], [], []>} : vector<64x128xbf16>, vector<128x256xbf16>, vector<64x256xf32> -> vector<64x256xf32>
    %15 = vector.broadcast %9 : vector<1x256xf32> to vector<64x256xf32>
    %16 = arith.addf %14, %15 : vector<64x256xf32>
    %17 = vector.extract_strided_slice %16 {offsets = [0, 0], sizes = [64, 128], strides = [1, 1]} : vector<64x256xf32> to vector<64x128xf32>
    %cst_17 = arith.constant 0.000000e+00 : f32
    %18 = vector.broadcast %cst_17 : f32 to vector<64x128xf32>
    %19 = arith.maximumf %17, %18 : vector<64x128xf32>
    %20 = vector.extract_strided_slice %16 {offsets = [0, 128], sizes = [64, 128], strides = [1, 1]} : vector<64x256xf32> to vector<64x128xf32>
    %21 = vector.shape_cast %20 : vector<64x128xf32> to vector<1x64x128xf32>
    %cst_18 = arith.constant dense<0.000000e+00> : vector<1x128xf32>
    %22 = vector.multi_reduction <add>, %21, %cst_18 [1] : vector<1x64x128xf32> to vector<1x128xf32>
    %cst_19 = arith.constant 1.562500e-02 : f32
    %23 = vector.broadcast %cst_19 : f32 to vector<1x128xf32>
    %24 = arith.mulf %22, %23 : vector<1x128xf32>
    %cst_20 = arith.constant 0.000000e+00 : f32
    %25 = vector.broadcast %cst_20 : f32 to vector<1x128xf32>
    %26 = arith.maximumf %24, %25 : vector<1x128xf32>
    %27 = vector.shape_cast %26 : vector<1x128xf32> to vector<1x1x128xf32>
    %28 = vector.shape_cast %27 : vector<1x1x128xf32> to vector<1x1x128xf32>
    %29 = vector.broadcast %28 : vector<1x1x128xf32> to vector<1x64x128xf32>
    %30 = vector.shape_cast %29 : vector<1x64x128xf32> to vector<64x128xf32>
    %31 = tpu.concatenate %19, %30 in 1 : vector<64x128xf32>, vector<64x128xf32> -> vector<64x256xf32>
    %32 = arith.truncf %31 : vector<64x256xf32> to vector<64x256xbf16>
    %cst_21 = arith.constant dense<0.000000e+00> : vector<64x128xf32>
    %33 = tpu.matmul %32, %11, %cst_21 {dimension_numbers = #tpu.dot_dimension_numbers<[1], [0], [0], [1], [0, 0, 1, 1], [], []>} : vector<64x256xbf16>, vector<256x128xbf16>, vector<64x128xf32> -> vector<64x128xf32>
    %34 = vector.broadcast %13 : vector<1x128xf32> to vector<64x128xf32>
    %35 = arith.addf %33, %34 : vector<64x128xf32>
    %cst_22 = arith.constant 0.000000e+00 : f32
    %36 = vector.broadcast %cst_22 : f32 to vector<64x128xf32>
    %37 = arith.subf %36, %35 : vector<64x128xf32>
    %38 = math.exp %37 : vector<64x128xf32>
    %cst_23 = arith.constant 1.000000e+00 : f32
    %39 = vector.broadcast %cst_23 : f32 to vector<64x128xf32>
    %40 = arith.addf %39, %38 : vector<64x128xf32>
    %41 = tpu.reciprocal %40 {approx = true} : vector<64x128xf32> -> vector<64x128xf32>
    %42 = arith.truncf %41 : vector<64x128xf32> to vector<64x128xbf16>
    %43 = arith.mulf %4, %42 : vector<64x128xbf16>
    %44 = arith.addf %3, %43 : vector<64x128xbf16>
    %c1 = arith.constant 1 : index
    %c0_24 = arith.constant 0 : index
    %c0_25 = arith.constant 0 : index
    %45 = vector.load %arg3[%c1, %c0_24, %c0_25] : memref<2x128x256xbf16, #tpu.memory_space<vmem>>, vector<1x128x256xbf16>
    %46 = vector.shape_cast %45 : vector<1x128x256xbf16> to vector<128x256xbf16>
    %c1_26 = arith.constant 1 : index
    %c0_27 = arith.constant 0 : index
    %c0_28 = arith.constant 0 : index
    %47 = vector.load %arg4[%c1_26, %c0_27, %c0_28] : memref<2x1x256xf32, #tpu.memory_space<vmem>>, vector<1x1x256xf32>
    %48 = vector.shape_cast %47 : vector<1x1x256xf32> to vector<1x256xf32>
    %c1_29 = arith.constant 1 : index
    %c0_30 = arith.constant 0 : index
    %c0_31 = arith.constant 0 : index
    %49 = vector.load %arg5[%c1_29, %c0_30, %c0_31] : memref<2x256x128xbf16, #tpu.memory_space<vmem>>, vector<1x256x128xbf16>
    %50 = vector.shape_cast %49 : vector<1x256x128xbf16> to vector<256x128xbf16>
    %c1_32 = arith.constant 1 : index
    %c0_33 = arith.constant 0 : index
    %c0_34 = arith.constant 0 : index
    %51 = vector.load %arg6[%c1_32, %c0_33, %c0_34] : memref<2x1x128xf32, #tpu.memory_space<vmem>>, vector<1x1x128xf32>
    %52 = vector.shape_cast %51 : vector<1x1x128xf32> to vector<1x128xf32>
    %cst_35 = arith.constant dense<0.000000e+00> : vector<64x256xf32>
    %53 = tpu.matmul %44, %46, %cst_35 {dimension_numbers = #tpu.dot_dimension_numbers<[1], [0], [0], [1], [0, 0, 1, 1], [], []>} : vector<64x128xbf16>, vector<128x256xbf16>, vector<64x256xf32> -> vector<64x256xf32>
    %54 = vector.broadcast %48 : vector<1x256xf32> to vector<64x256xf32>
    %55 = arith.addf %53, %54 : vector<64x256xf32>
    %56 = vector.extract_strided_slice %55 {offsets = [0, 0], sizes = [64, 128], strides = [1, 1]} : vector<64x256xf32> to vector<64x128xf32>
    %cst_36 = arith.constant 0.000000e+00 : f32
    %57 = vector.broadcast %cst_36 : f32 to vector<64x128xf32>
    %58 = arith.maximumf %56, %57 : vector<64x128xf32>
    %59 = vector.extract_strided_slice %55 {offsets = [0, 128], sizes = [64, 128], strides = [1, 1]} : vector<64x256xf32> to vector<64x128xf32>
    %60 = vector.shape_cast %59 : vector<64x128xf32> to vector<1x64x128xf32>
    %cst_37 = arith.constant dense<0.000000e+00> : vector<1x128xf32>
    %61 = vector.multi_reduction <add>, %60, %cst_37 [1] : vector<1x64x128xf32> to vector<1x128xf32>
    %cst_38 = arith.constant 1.562500e-02 : f32
    %62 = vector.broadcast %cst_38 : f32 to vector<1x128xf32>
    %63 = arith.mulf %61, %62 : vector<1x128xf32>
    %cst_39 = arith.constant 0.000000e+00 : f32
    %64 = vector.broadcast %cst_39 : f32 to vector<1x128xf32>
    %65 = arith.maximumf %63, %64 : vector<1x128xf32>
    %66 = vector.shape_cast %65 : vector<1x128xf32> to vector<1x1x128xf32>
    %67 = vector.shape_cast %66 : vector<1x1x128xf32> to vector<1x1x128xf32>
    %68 = vector.broadcast %67 : vector<1x1x128xf32> to vector<1x64x128xf32>
    %69 = vector.shape_cast %68 : vector<1x64x128xf32> to vector<64x128xf32>
    %70 = tpu.concatenate %58, %69 in 1 : vector<64x128xf32>, vector<64x128xf32> -> vector<64x256xf32>
    %71 = arith.truncf %70 : vector<64x256xf32> to vector<64x256xbf16>
    %cst_40 = arith.constant dense<0.000000e+00> : vector<64x128xf32>
    %72 = tpu.matmul %71, %50, %cst_40 {dimension_numbers = #tpu.dot_dimension_numbers<[1], [0], [0], [1], [0, 0, 1, 1], [], []>} : vector<64x256xbf16>, vector<256x128xbf16>, vector<64x128xf32> -> vector<64x128xf32>
    %73 = vector.broadcast %52 : vector<1x128xf32> to vector<64x128xf32>
    %74 = arith.addf %72, %73 : vector<64x128xf32>
    %cst_41 = arith.constant 0.000000e+00 : f32
    %75 = vector.broadcast %cst_41 : f32 to vector<64x128xf32>
    %76 = arith.subf %75, %74 : vector<64x128xf32>
    %77 = math.exp %76 : vector<64x128xf32>
    %cst_42 = arith.constant 1.000000e+00 : f32
    %78 = vector.broadcast %cst_42 : f32 to vector<64x128xf32>
    %79 = arith.addf %78, %77 : vector<64x128xf32>
    %80 = tpu.reciprocal %79 {approx = true} : vector<64x128xf32> -> vector<64x128xf32>
    %81 = arith.truncf %80 : vector<64x128xf32> to vector<64x128xbf16>
    %82 = arith.mulf %4, %81 : vector<64x128xbf16>
    %83 = arith.addf %3, %82 : vector<64x128xbf16>
    %84 = vector.shape_cast %83 : vector<64x128xbf16> to vector<1x64x128xbf16>
    %c0_43 = arith.constant 0 : index
    %c0_44 = arith.constant 0 : index
    %c0_45 = arith.constant 0 : index
    %85 = vector.load %arg7[%c0_43, %c0_44, %c0_45] : memref<1x64x128xbf16, #tpu.memory_space<vmem>>, vector<1x64x128xbf16>
    tpu.vector_store %arg7[%c0_43, %c0_44, %c0_45], %84 {strides = array<i32>} : memref<1x64x128xbf16, #tpu.memory_space<vmem>>, vector<1x64x128xbf16>,
    return
  }
  func.func @transform_0(%arg0: i32) -> (i32, i32, i32) {
    %c0_i32 = arith.constant 0 : i32
    %c0_i32_0 = arith.constant 0 : i32
    %c0_i32_1 = arith.constant 0 : i32
    return %arg0, %c0_i32, %c0_i32_0 : i32, i32, i32
  }
  func.func @transform_1(%arg0: i32) -> (i32, i32, i32) {
    %c0_i32 = arith.constant 0 : i32
    %c0_i32_0 = arith.constant 0 : i32
    %c0_i32_1 = arith.constant 0 : i32
    return %arg0, %c0_i32, %c0_i32_0 : i32, i32, i32
  }
  func.func @transform_2(%arg0: i32) -> (i32, i32, i32) {
    %c0_i32 = arith.constant 0 : i32
    %c0_i32_0 = arith.constant 0 : i32
    %c0_i32_1 = arith.constant 0 : i32
    %c0_i32_2 = arith.constant 0 : i32
    return %c0_i32, %c0_i32_0, %c0_i32_1 : i32, i32, i32
  }
  func.func @transform_3(%arg0: i32) -> (i32, i32, i32) {
    %c0_i32 = arith.constant 0 : i32
    %c0_i32_0 = arith.constant 0 : i32
    %c0_i32_1 = arith.constant 0 : i32
    %c0_i32_2 = arith.constant 0 : i32
    return %c0_i32, %c0_i32_0, %c0_i32_1 : i32, i32, i32
  }
  func.func @transform_4(%arg0: i32) -> (i32, i32, i32) {
    %c0_i32 = arith.constant 0 : i32
    %c0_i32_0 = arith.constant 0 : i32
    %c0_i32_1 = arith.constant 0 : i32
    %c0_i32_2 = arith.constant 0 : i32
    return %c0_i32, %c0_i32_0, %c0_i32_1 : i32, i32, i32
  }
  func.func @transform_5(%arg0: i32) -> (i32, i32, i32) {
    %c0_i32 = arith.constant 0 : i32
    %c0_i32_0 = arith.constant 0 : i32
    %c0_i32_1 = arith.constant 0 : i32
    %c0_i32_2 = arith.constant 0 : i32
    return %c0_i32, %c0_i32_0, %c0_i32_1 : i32, i32, i32
  }
  func.func @transform_6(%arg0: i32) -> (i32, i32, i32) {
    %c0_i32 = arith.constant 0 : i32
    %c0_i32_0 = arith.constant 0 : i32
    %c0_i32_1 = arith.constant 0 : i32
    return %arg0, %c0_i32, %c0_i32_0 : i32, i32, i32
  }
}

</mosaic_0001>

<bundles_post_ra>
// kernel: tpu_custom_call.1
= control target key start
LH: loop header
LB: loop body
LE: loop exit
PB: predicated region body
PF: predicated region fallthrough
CT: control target
= control target key end

     0   :  { %s2732_s0 = inlined_call_operand.hbm [shape: bf16[2,64,128], index: 0, kind: input, shape index: {}]   ;;  %s2733_s1 = inlined_call_operand.hbm [shape: bf16[2,64,128], index: 1, kind: input, shape index: {}]   ;;  %s2734_s2 = inlined_call_operand.hbm [shape: bf16[2,128,256], index: 2, kind: input, shape index: {}]   ;;  %s2735_s3 = inlined_call_operand.vmem [shape: f32[2,1,256], index: 3, kind: input, shape index: {}]   ;;  %s2736_s4 = inlined_call_operand.hbm [shape: bf16[2,256,128], index: 4, kind: input, shape index: {}]   ;;  %s2737_s5 = inlined_call_operand.vmem [shape: f32[2,1,128], index: 5, kind: input, shape index: {}]   ;;  %s2738_s6 = inlined_call_operand.hbm [shape: bf16[2,64,128], index: 6, kind: output, shape index: {}]  }
   0x1   :  { %2746 = sst [smem:[#allocation16_spill]] %s2732_s0 }
   0x2   :  { %2747 = sst [smem:[#allocation17_spill]] %s2734_s2 }
   0x3   :  { %2748 = sst [smem:[#allocation18_spill]] %s2736_s4 }
   0x4   :  { %11 = vsyncpa [#allocation3], 0 }
   0x5   :  { %13 = vsyncpa [#allocation3 + $0x1], 0 }
   0x6   :  { %14 = vsyncpa [#allocation6], 0 }
   0x7   :  { %16 = vsyncpa [#allocation6 + $0x1], 0 }
   0x8   :  { %17 = vsyncpa [#allocation9], 0 }
   0x9   :  { %18 = vsyncpa [#allocation4], 0 }
   0xa   :  { %20 = vsyncpa [#allocation4 + $0x1], 0  ;;  %s2267_s21 = smov 0   ;;  %s2269_s22 = smov 0  }
   0xb   :  { %s2271_s23 = smov 0   ;;  %s2273_s24 = smov 0  }
   0xc LB: > { %s2288_s25 = sadd.s32 4294967295, %s2218_s24   ;;  %s1555_s26 = sadd.s32 4294967294, %s2218_s24   ;;  %s2218_s24 = sphi %s2273_s24, %s2772_s24   ;;  %s2214_s23 = sphi %s2271_s23, %s2771_s23   ;;  %s2210_s22 = sphi %s2269_s22, %s2770_s22   ;;  %s2206_s21 = sphi %s2267_s21, %s2769_s21  }
   0xd   : > { %p46_p0 = scmp.ne.s32.totalorder %s2210_s22, %s2206_s21  ;;  %p2739_p1 = scmp.eq.s32.totalorder %s2288_s25, 0 }
   0xe   : > { %p186_p3 = scmp.eq.s32.totalorder %s1555_s26, 1  ;;  %p1556_p5 = scmp.ge.s32.totalorder %s2218_s24, 1 }
   0xf   : > { %p2297_p4 = por %p2739_p1, %p46_p0  ;;  %p193_p7 = scmp.lt.s32.totalorder %s2218_s24, 3 }
  0x10   : > { %p2302_p6 = por %p186_p3, %p46_p0  ;;  %s2220_s30 = smov [#allocation7]  }
  0x11   : > { %s2749_s27 = scalar_select %p2297_p4, 1, 0 }
  0x12   : > { %s2750_s28 = scalar_select %p2302_p6, 1, 0 }
  0x13   : > { %p2307_p8 = pnand %p1556_p5, %p193_p7  ;;  %s205_s7 = sshll.u32 %s2220_s30, 4  ;;  %s2311_s7 = int_to_ptr.vmem [resolvable:$true] %s205_s7 }
  0x14   : > { %s2221_s9 = smov [#allocation8]   ;;  %s2753_s2 = sld [smem:[#allocation17_spill]] }
  0x15   : > { %p1809_p9 = pneg %p2307_p8  ;;  %s221_s10 = sshll.u32 %s2221_s9, 4  ;;  %s2322_s10 = int_to_ptr.vmem [resolvable:$true] %s221_s10 }
  0x17   : > { %p2318_p11 = pnand %p1809_p9, %p2739_p1 }
  0x19   : > { %p2026_p13 = pneg %p2318_p11 }
  0x1a   : > { %s2024_s13 = scalar_lea.hbm %s2753_s2, 4096 }
  0x1b   : > { %p2025_p12 = scmp.ne.s32.totalorder %s2753_s2, %s2024_s13  ;;  %p2031_p5 = scmp.lt.u32.totalorder %s2024_s13, %s2753_s2 }
  0x1d   : > { %p2027_p0 = pnand %p2026_p13, %p2025_p12 }
  0x1f   : > { %p2028_p3 = pneg %p2027_p0 }
  0x21   : > { %p2033_p7 = pnand %p2031_p5, %p2028_p3 }
  0x23   : > { %2036 = shalt.err (!%p2033_p7)
}
  0x24   : > { %s2037_s18 = scalar_lea.vmem %s2311_s7, 4096  ;;  %p2045_p2 = scmp.lt.s32.totalorder %s2311_s7, %s2311_s7 }
  0x25   : > { %p2038_p9 = scmp.ne.s32.totalorder %s2311_s7, %s2037_s18  ;;  %p2046_p12 = scmp.lt.s32.totalorder %s2037_s18, %s2037_s18 }
  0x27   : > { %p2040_p10 = pnand %p2038_p9, %p2026_p13  ;;  %p2047_p0 = por %p2046_p12, %p2045_p2 }
  0x29   : > { %p2041_p1 = pneg %p2040_p10 }
  0x2b   : > { %p2048_p6 = pnand %p2047_p0, %p2041_p1 }
  0x2d   : > { %2051 = shalt.err (!%p2048_p6)
}
  0x2e   : > { %s2222_s19 = smov 128   ;;  %s2223_s20 = smov 8  }
  0x2f   : > { %1812 = dma.hbm_to_vmem [thread:$0]  (!%p2318_p11), %s2753_s2, 4096, %s2311_s7, [#allocation6], %s2222_s19, %s2222_s19, %s2223_s20  }
  0x30   : > { %s2754_s4 = sld [smem:[#allocation18_spill]] }
  0x36   : > { %s2052_s12 = scalar_lea.hbm %s2754_s4, 4096 }
  0x37   : > { %p2053_p2 = scmp.ne.s32.totalorder %s2754_s4, %s2052_s12  ;;  %p2059_p10 = scmp.lt.u32.totalorder %s2052_s12, %s2754_s4 }
  0x39   : > { %p2055_p1 = pnand %p2053_p2, %p2026_p13 }
  0x3b   : > { %p2056_p6 = pneg %p2055_p1 }
  0x3d   : > { %p2061_p3 = pnand %p2059_p10, %p2056_p6 }
  0x3f   : > { %2064 = shalt.err (!%p2061_p3)
}
  0x40   : > { %s2065_s7 = scalar_lea.vmem %s2322_s10, 4096  ;;  %p2073_p12 = scmp.lt.s32.totalorder %s2322_s10, %s2322_s10 }
  0x41   : > { %p2066_p5 = scmp.ne.s32.totalorder %s2322_s10, %s2065_s7  ;;  %p2074_p0 = scmp.lt.s32.totalorder %s2065_s7, %s2065_s7 }
  0x43   : > { %p2068_p7 = pnand %p2066_p5, %p2026_p13  ;;  %p2075_p2 = por %p2074_p0, %p2073_p12 }
  0x45   : > { %p2069_p9 = pneg %p2068_p7 }
  0x47   : > { %p2076_p1 = pnand %p2075_p2, %p2069_p9 }
  0x49   : > { %2079 = shalt.err (!%p2076_p1)
}
  0x4a   : > { %s2740_s17 = smov 64   ;;  %s2742_s18 = smov 4  }
  0x4b   : > { %1815 = dma.hbm_to_vmem [thread:$0]  (!%p2318_p11), %s2754_s4, 4096, %s2322_s10, [#allocation9], %s2740_s17, %s2740_s17, %s2742_s18  }
  0x4c   : > { %s2380_s26 = sadd.s32 1, %s2218_s24   ;;  %s33_s9 = sadd.s32 1, %s2214_s23 }
  0x4d   : > { %s30_s30 = ssub.s32 %s2218_s24, %s2380_s26  ;;  %p40_p6 = scmp.ne.s32.totalorder %s2214_s23, %s2210_s22 }
  0x4e   : > { %p31_p13 = scmp.eq.s32.totalorder %s30_s30, 0  ;;  %p41_p10 = scmp.eq.s32.totalorder %s2218_s24, 0 }
  0x4f   : > { %p2755_p5 = scmp.eq.s32.totalorder %s2288_s25, 1  ;;  %p1829_p9 = scmp.lt.s32.totalorder %s2218_s24, 2 }
  0x50   : > { %s2389_s11 = scalar_select %p31_p13, %s2214_s23, %s33_s9  }
  0x51   : > { %p42_p3 = por %p41_p10, %p40_p6  ;;  %p2393_p7 = por %p2755_p5, %p40_p6 }
  0x52   : > { %s238_s12 = sand.u32 1, %s2214_s23   ;;  %s1669_s10 = sshll.u32 %s2218_s24, 9 }
  0x53   : > { %s2756_s8 = scalar_select %p2393_p7, 1, 0 }
  0x54   : > { %s1560_s13 = sshll.u32 %s238_s12, 5  ;;  %s2757_s0 = sld [smem:[#allocation16_spill]] }
  0x55   : > { %s242_s7 = scalar_lea.vmem [#allocation2], %s1560_s13  ;;  %p2407_p11 = pnand %p1829_p9, %p42_p3 }
  0x56   : > { %s249_s19 = sshll.u32 %s242_s7, 4  ;;  %s2414_s14 = scalar_lea.hbm %s2733_s1, %s1669_s10  ;;  %s2405_s19 = int_to_ptr.vmem [resolvable:$true] %s249_s19 }
  0x57   : > { %s263_s15 = scalar_lea.vmem [#allocation5], %s1560_s13  ;;  %s2418_s18 = scalar_lea.sflag [#allocation3], %s238_s12 }
  0x58   : > { %s2416_s17 = sshll.u32 %s263_s15, 4  ;;  %p2082_p0 = pneg %p2407_p11  ;;  %s2450_s17 = int_to_ptr.vmem [resolvable:$true] %s2416_s17 }
  0x5a   : > { %s2403_s16 = scalar_lea.hbm %s2757_s0, %s1669_s10  ;;  %s2085_s30 = scalar_lea.hbm %s2757_s0, 1024 }
  0x5b   : > { %s2080_s7 = scalar_lea.hbm %s2403_s16, 512  ;;  %p2086_p13 = scmp.lt.u32.totalorder %s2403_s16, %s2757_s0 }
  0x5c   : > { %p2081_p12 = scmp.ne.s32.totalorder %s2403_s16, %s2080_s7  ;;  %p2087_p6 = scmp.lt.u32.totalorder %s2085_s30, %s2080_s7 }
  0x5d   : > { %p2089_p3 = scmp.lt.u32.totalorder %s2080_s7, %s2403_s16 }
  0x5e   : > { %p2083_p2 = pnand %p2082_p0, %p2081_p12  ;;  %p2088_p10 = por %p2087_p6, %p2086_p13 }
  0x60   : > { %p2084_p1 = pneg %p2083_p2  ;;  %p2090_p5 = por %p2089_p3, %p2088_p10 }
  0x62   : > { %p2091_p9 = pnand %p2090_p5, %p2084_p1 }
  0x64   : > { %2094 = shalt.err (!%p2091_p9)
}
  0x65   : > { %s2095_s12 = scalar_lea.vmem %s2405_s19, 512  ;;  %s2226_s2 = smov [#allocation2]  }
  0x66   : > { %p2096_p12 = scmp.ne.s32.totalorder %s2405_s19, %s2095_s12  ;;  %s2100_s4 = sshll.u32 %s2226_s2, 4  ;;  %s2101_s4 = int_to_ptr.vmem [resolvable:$false] %s2100_s4 }
  0x67   : > { %s2102_s13 = scalar_lea.vmem %s2101_s4, 1024  ;;  %p2103_p4 = scmp.lt.s32.totalorder %s2405_s19, %s2101_s4 }
  0x68   : > { %p2098_p2 = pnand %p2096_p12, %p2082_p0  ;;  %p2104_p13 = scmp.lt.s32.totalorder %s2102_s13, %s2095_s12 }
  0x6a   : > { %p2099_p7 = pneg %p2098_p2  ;;  %p2105_p6 = por %p2104_p13, %p2103_p4 }
  0x6c   : > { %p2106_p10 = pnand %p2105_p6, %p2099_p7 }
  0x6e   : > { %2109 = shalt.err (!%p2106_p10)
}
  0x6f   : > { %s2759_s15 = smov 4   ;;  %s2760_s7 = smov 64  }
  0x70   : > { %1819 = dma.hbm_to_vmem [thread:$0]  (!%p2407_p11), %s2403_s16, 512, %s2405_s19, %s2418_s18, %s2760_s7, %s2760_s7, %s2759_s15  }
  0x71   : > { %s259_s30 = sand.u32 1, %s2218_s24   ;;  %s2110_s10 = scalar_lea.hbm %s2414_s14, 512 }
  0x72   : > { %s2453_s9 = scalar_lea.sflag [#allocation6], %s259_s30  ;;  %p2111_p4 = scmp.ne.s32.totalorder %s2414_s14, %s2110_s10 }
  0x73   : > { %s2115_s4 = scalar_lea.hbm %s2733_s1, 1024  ;;  %p2116_p3 = scmp.lt.u32.totalorder %s2414_s14, %s2733_s1 }
  0x74   : > { %p2113_p7 = pnand %p2111_p4, %p2082_p0  ;;  %p2117_p5 = scmp.lt.u32.totalorder %s2115_s4, %s2110_s10 }
  0x75   : > { %p2119_p12 = scmp.lt.u32.totalorder %s2110_s10, %s2414_s14 }
  0x76   : > { %p2114_p1 = pneg %p2113_p7  ;;  %p2118_p9 = por %p2117_p5, %p2116_p3 }
  0x78   : > { %p2120_p2 = por %p2119_p12, %p2118_p9 }
  0x7a   : > { %p2121_p13 = pnand %p2120_p2, %p2114_p1 }
  0x7c   : > { %2124 = shalt.err (!%p2121_p13)
}
  0x7d   : > { %s2125_s18 = scalar_lea.vmem %s2450_s17, 512  ;;  %s2227_s16 = smov [#allocation5]  }
  0x7e   : > { %p2126_p6 = scmp.ne.s32.totalorder %s2450_s17, %s2125_s18  ;;  %s2130_s19 = sshll.u32 %s2227_s16, 4  ;;  %s2131_s19 = int_to_ptr.vmem [resolvable:$false] %s2130_s19 }
  0x7f   : > { %s2132_s0 = scalar_lea.vmem %s2131_s19, 1024  ;;  %p2133_p7 = scmp.lt.s32.totalorder %s2450_s17, %s2131_s19 }
  0x80   : > { %p2128_p10 = pnand %p2126_p6, %p2082_p0  ;;  %p2134_p3 = scmp.lt.s32.totalorder %s2132_s0, %s2125_s18 }
  0x82   : > { %p2129_p4 = pneg %p2128_p10  ;;  %p2135_p5 = por %p2134_p3, %p2133_p7 }
  0x84   : > { %p2136_p9 = pnand %p2135_p5, %p2129_p4 }
  0x86   : > { %2139 = shalt.err (!%p2136_p9)
}
  0x87   : > { %1822 = dma.hbm_to_vmem [thread:$0]  (!%p2407_p11), %s2414_s14, 512, %s2450_s17, %s2453_s9, %s2760_s7, %s2760_s7, %s2759_s15  }
  0x88   : > { %282 = sbr.rel (%p2307_p8) target bundleno = 1259 (0x4eb), region = 44  ;;  %s2485_s30 = sand.u32 (!%p2307_p8), 1, %s2210_s22  }
  0x89   : > { %s2488_s10 = sshll.u32 (!%p2307_p8), %s2485_s30, 5  ;;  %s285_s20 = scalar_lea.sflag (!%p2307_p8), [#allocation3], %s2485_s30 }
  0x8a   : > { %s2492_s12 = scalar_lea.vmem (!%p2307_p8), [#allocation2], %s2488_s10  ;;  %p2761_p0 = scmp.ne.s32.totalorder (!%p2307_p8), %s2749_s27, 0 }
  0x8f   : > { %2185 = dma.done.wait (%p2761_p0), %s285_s20, 512  }
  0x90   : > { %2187 = vsyncadd (%p2761_p0), %s285_s20, 4294966784  ;;  %s293_s29 = sand.u32 1, %s2288_s25   ;;  %s2500_s14 = scalar_lea.vmem [#allocation5], %s2488_s10 }
  0x91   : > { %s294_s17 = scalar_lea.sflag [#allocation6], %s293_s29 }
  0x92   : > { %2189 = dma.done.wait (%p2761_p0), %s294_s17, 512  }
  0x93   : > { %2191 = vsyncadd (%p2761_p0), %s294_s17, 4294966784  ;;  %p2762_p8 = scmp.eq.s32.totalorder %s2288_s25, 0 }
  0x95   : > { %2193 = dma.done.wait (%p2762_p8), [#allocation6], 4096   ;;  %p2763_p11 = pmov %p2762_p8 }
  0x96   : > { %p2764_p1 = pmov %p2762_p8 }
  0x97   : > { %2195 = vsyncadd (%p2763_p11), [#allocation6], 4294963200 }
  0x98   : > { %2197 = dma.done.wait (%p2764_p1), [#allocation9], 4096   ;;  %p2765_p12 = pmov %p2764_p1 }
  0x99   : > { %v2228_v0 = vmov 0   ;;  %v1874_v1 = vld [vmem:[#allocation7 + $0x4] ss:$8 sps:$4 sm:$0xff]   ;;  %v1876_v2 = vld [vmem:[#allocation7] ss:$8 sps:$4 sm:$0xff]   ;;  %v1902_v49 = vld [vmem:[#allocation8 + $0x50] sm:$0xff]   ;;  %v423_v61 = vlaneseq }
  0x9a   : > { %2199 = vsyncadd (%p2765_p12), [#allocation9], 4294963200  ;;  %569 = vmatprep.mubr.bf16.mxu0 %v2228_v0  ;;  %537 = vmatprep.subr.bf16.mxu0 %v1874_v1  ;;  %v1877_v3 = vld [vmem:[#allocation7 + $0x14] ss:$8 sps:$4 sm:$0xff]   ;;  %v1879_v4 = vld [vmem:[#allocation7 + $0x10] ss:$8 sps:$4 sm:$0xff]  }
  0x9b   : > { %538 = vmatpush1.bf16.msra.mxu0 %v1876_v2  ;;  %v1880_v5 = vld [vmem:[#allocation7 + $0x24] ss:$8 sps:$4 sm:$0xff]   ;;  %v1882_v6 = vld [vmem:[#allocation7 + $0x20] ss:$8 sps:$4 sm:$0xff]   ;;  %v1883_v7 = vld [vmem:[#allocation7 + $0x34] ss:$8 sps:$4 sm:$0xff]  }
  0x9c   : > { %539 = vmatprep.subr.bf16.mxu0 %v1877_v3  ;;  %v1885_v8 = vld [vmem:[#allocation7 + $0x30] ss:$8 sps:$4 sm:$0xff]   ;;  %v1886_v9 = vld [vmem:[#allocation7 + $0x44] ss:$8 sps:$4 sm:$0xff]   ;;  %v1888_v10 = vld [vmem:[#allocation7 + $0x40] ss:$8 sps:$4 sm:$0xff]  }
  0x9d   : > { %v1889_v11 = vld [vmem:[#allocation7 + $0x54] ss:$8 sps:$4 sm:$0xff]   ;;  %v1891_v12 = vld [vmem:[#allocation7 + $0x50] ss:$8 sps:$4 sm:$0xff]   ;;  %v1892_v13 = vld [vmem:[#allocation7 + $0x64] ss:$8 sps:$4 sm:$0xff]  }
  0x9e   : > { %v1894_v14 = vld [vmem:[#allocation7 + $0x60] ss:$8 sps:$4 sm:$0xff]   ;;  %v2519_v16 = vld [vmem:[%s2492_s12 + $0x4] sm:$0xf]  ;;  %v1895_v19 = vld [vmem:[#allocation7 + $0x74] ss:$8 sps:$4 sm:$0xff]  }
  0x9f   : > { %540 = vmatpush1.bf16.msra.mxu0 %v1879_v4  ;;  %v2516_v15 = vld [vmem:[%s2492_s12] sm:$0xf]  ;;  %v2525_v18 = vld [vmem:[%s2500_s14 + $0x4] sm:$0xf]  ;;  %v1897_v20 = vld [vmem:[#allocation7 + $0x70] ss:$8 sps:$4 sm:$0xff]  }
  0xa0   : > { %541 = vmatprep.subr.bf16.mxu0 %v1880_v5  ;;  %v2522_v17 = vld [vmem:[%s2500_s14] sm:$0xf]  ;;  %v365_v22 = vadd.bf16 %v2525_v18, %v2519_v16  ;;  %v2532_v23 = vld [vmem:[%s2492_s12 + $0x8] sm:$0xf]  ;;  %v2535_v24 = vld [vmem:[%s2492_s12 + $0xc] sm:$0xf] }
  0xa1   : > { %v364_v21 = vadd.bf16 %v2522_v17, %v2516_v15  ;;  %v2538_v25 = vld [vmem:[%s2500_s14 + $0x8] sm:$0xf]  ;;  %v2541_v26 = vld [vmem:[%s2500_s14 + $0xc] sm:$0xf]  ;;  %v2549_v30 = vld [vmem:[%s2492_s12 + $0x10] sm:$0xf] }
  0xa2   : > { %v366_v28 = vadd.bf16 %v2538_v25, %v2532_v23  ;;  %v367_v29 = vadd.bf16 %v2541_v26, %v2535_v24  ;;  %v2552_v31 = vld [vmem:[%s2492_s12 + $0x14] sm:$0xf]  ;;  %v2555_v32 = vld [vmem:[%s2500_s14 + $0x10] sm:$0xf]  ;;  %v2566_v38 = vld [vmem:[%s2492_s12 + $0x18] sm:$0xf] }
  0xa3   : > { %542 = vmatpush1.bf16.msra.mxu0 %v1882_v6  ;;  %v1572_v27 = vcombine.low %v364_v21, %v365_v22  ;;  %v2558_v33 = vld [vmem:[%s2500_s14 + $0x14] sm:$0xf]  ;;  %v368_v35 = vadd.bf16 %v2555_v32, %v2549_v30  ;;  %v2569_v39 = vld [vmem:[%s2492_s12 + $0x1c] sm:$0xf]  ;;  %v2572_v40 = vld [vmem:[%s2500_s14 + $0x18] sm:$0xf] }
  0xa4   : > { %543 = vmatprep.subr.bf16.mxu0 %v1883_v7  ;;  %v1573_v34 = vcombine.low %v366_v28, %v367_v29  ;;  %v369_v36 = vadd.bf16 %v2558_v33, %v2552_v31  ;;  %v2575_v41 = vld [vmem:[%s2500_s14 + $0x1c] sm:$0xf]  ;;  %v370_v42 = vadd.bf16 %v2572_v40, %v2566_v38  ;;  %v1898_v45 = vld [vmem:[#allocation8 + $0x40] sm:$0xff]   ;;  %v1900_v47 = vld [vmem:[#allocation8 + $0x48] sm:$0xff]   ;;  %v2583_v62 = vshrl.u32 %v423_v61, 7  ;;  %s2663_s16 = scalar_lea.vmem [#allocation10], %s2488_s10 }
  0xa5   : > { %v371_v43 = vadd.bf16 %v2575_v41, %v2569_v39  ;;  %v1899_v46 = vld [vmem:[#allocation8] sm:$0xff]   ;;  %1715 = vmatprep.subr.bf16.mxu1 %v1898_v45  ;;  %v1901_v48 = vld [vmem:[#allocation8 + $0x8] sm:$0xff]   ;;  %v1903_v50 = vld [vmem:[#allocation8 + $0x10] sm:$0xff]   ;;  %s1687_s19 = sshll.u32 %s2288_s25, 9  ;;  %s1440_s0 = sshll.u32 %s2663_s16, 4  ;;  %s2687_s0 = int_to_ptr.vmem [resolvable:$true] %s1440_s0 }
  0xa6   : > { %v1574_v37 = vcombine.low %v368_v35, %v369_v36  ;;  %1716 = vmatpush3.bf16.msra.mxu1 %v1899_v46  ;;  %v1904_v51 = vld [vmem:[#allocation8 + $0x58] sm:$0xff]   ;;  %v1906_v53 = vld [vmem:[#allocation8 + $0x60] sm:$0xff]   ;;  %v1908_v55 = vld [vmem:[#allocation8 + $0x68] sm:$0xff]   ;;  %v425_v63 = vsub.s32 0, %v2583_v62  ;;  %v429_v2 = vsub.s32 1, %v2583_v62  ;;  %s2685_s12 = scalar_lea.hbm %s2738_s6, %s1687_s19  ;;  %s1427_s29 = scalar_lea.sflag [#allocation4], %s2485_s30 }
  0xa7   : > { %544 = vmatpush1.bf16.msra.mxu0 %v1885_v8  ;;  %v1575_v44 = vcombine.low %v370_v42, %v371_v43  ;;  %1717 = vmatprep.subr.bf16.mxu1 %v1900_v47  ;;  %v1905_v52 = vld [vmem:[#allocation8 + $0x18] sm:$0xff]   ;;  %v1907_v54 = vld [vmem:[#allocation8 + $0x20] sm:$0xff]   ;;  %v1909_v56 = vld [vmem:[#allocation8 + $0x28] sm:$0xff]   ;;  %s2140_s17 = scalar_lea.vmem %s2687_s0, 512  ;;  %p2766_p13 = scmp.ne.s32.totalorder %s2756_s8, 0 }
  0xa8   : > { %545 = vmatprep.subr.bf16.mxu0 %v1886_v9  ;;  %v1910_v57 = vld [vmem:[#allocation8 + $0x70] sm:$0xff]   ;;  %v1912_v59 = vld [vmem:[#allocation8 + $0x78] sm:$0xff]   ;;  %v388_v1 = vld [vmem:[%s2735_s3] sm:$0x3]  ;;  %p2141_p2 = scmp.ne.s32.totalorder %s2687_s0, %s2140_s17  ;;  %s2229_s25 = smov [#allocation10]  }
  0xa9   : > { %v1911_v58 = vld [vmem:[#allocation8 + $0x30] sm:$0xff]   ;;  %v1913_v60 = vld [vmem:[#allocation8 + $0x38] sm:$0xff]   ;;  %v426_v3 = vrot.slane %v388_v1, %v425_v63  ;;  %v430_v5 = vrot.slane %v388_v1, %v429_v2 }
  0xaa   : > { %1718 = vmatpush3.bf16.msra.mxu1 %v1901_v48  ;;  %p2142_p6 = pnand %p2141_p2, %p2766_p13 }
  0xab   : > { %546 = vmatpush1.bf16.msra.mxu0 %v1888_v10  ;;  %1719 = vmatprep.subr.bf16.mxu1 %v1902_v49 }
  0xac   : > { %547 = vmatprep.subr.bf16.mxu0 %v1889_v11  ;;  %p2143_p10 = pneg %p2142_p6 }
  0xae   : > { %1720 = vmatpush3.bf16.msra.mxu1 %v1903_v50 }
  0xaf   : > { %548 = vmatpush1.bf16.msra.mxu0 %v1891_v12  ;;  %1721 = vmatprep.subr.bf16.mxu1 %v1904_v51 }
  0xb0   : > { %549 = vmatprep.subr.bf16.mxu0 %v1892_v13 }
  0xb2   : > { %1722 = vmatpush3.bf16.msra.mxu1 %v1905_v52 }
  0xb3   : > { %550 = vmatpush1.bf16.msra.mxu0 %v1894_v14  ;;  %1723 = vmatprep.subr.bf16.mxu1 %v1906_v53 }
  0xb4   : > { %551 = vmatprep.subr.bf16.mxu0 %v1895_v19 }
  0xb6   : > { %1724 = vmatpush3.bf16.msra.mxu1 %v1907_v54 }
  0xb7   : > { %552 = vmatpush1.bf16.msra.mxu0 %v1897_v20  ;;  %1725 = vmatprep.subr.bf16.mxu1 %v1908_v55 }
  0xba   : > { %570 = vmatmul.mubr.bf16.vlgmr.msra.gmra.mrb[0].mxu0 %v1572_v27  ;;  %1726 = vmatpush3.bf16.msra.mxu1 %v1909_v56 }
  0xbb   : > { %579 = vmatprep.mubr.bf16.mxu0 %v2228_v0  ;;  %1727 = vmatprep.subr.bf16.mxu1 %v1910_v57 }
  0xbe   : > { %1728 = vmatpush3.bf16.msra.mxu1 %v1911_v58 }
  0xbf   : > { %1729 = vmatprep.subr.bf16.mxu1 %v1912_v59 }
  0xc2   : > { %580 = vmatmul.mubr.bf16.gmra.mrb[4].mxu0 %v1573_v34  ;;  %1730 = vmatpush3.bf16.msra.mxu1 %v1913_v60 }
  0xc3   : > { %589 = vmatprep.mubr.bf16.mxu0 %v2228_v0 }
  0xca   : > { %590 = vmatmul.mubr.bf16.gmra.mrb[8].mxu0 %v1574_v37 }
  0xcb   : > { %599 = vmatprep.mubr.bf16.mxu0 %v2228_v0 }
  0xd2   : > { %600 = vmatmul.mubr.bf16.gmra.mrb[12].mxu0 %v1575_v44 }
  0xd3   : > { %1094 = vmatprep.mubr.bf16.mxu0 %v2228_v0 }
 0x18d   : > { %v571_v4 = vpop.f32.mrb[0].mxu0 }
 0x18e   : > { %v572_v6 = vadd.f32 %v571_v4, %v426_v3  ;;  %v573_v7 = vpop.f32.mrb[1].mxu0 }
 0x18f   : > { %v575_v8 = vpop.f32.mrb[2].mxu0  ;;  %v574_v11 = vadd.f32 %v573_v7, %v430_v5 }
 0x190   : > { %v576_v9 = vadd.f32 %v575_v8, %v426_v3  ;;  %v577_v10 = vpop.f32.mrb[3].mxu0  ;;  %v610_v13 = vmax.f32 %v572_v6, 0.0 }
 0x191   : > { %v578_v12 = vadd.f32 %v577_v10, %v430_v5 }
 0x192   : > { %v611_v14 = vmax.f32 %v576_v9, 0.0 }
 0x193   : > { %v618_v19 = vadd.f32 %v578_v12, %v574_v11 }
 0x194   : > { %v633_v20 = vpack.c.bf16 %v611_v14, %v610_v13 }
 0x195   : > { %v581_v21 = vpop.f32.mrb[4].mxu0 }
 0x196   : > { %v582_v22 = vadd.f32 %v581_v21, %v426_v3  ;;  %v583_v27 = vpop.f32.mrb[5].mxu0 }
 0x197   : > { %v584_v28 = vadd.f32 %v583_v27, %v430_v5  ;;  %v585_v29 = vpop.f32.mrb[6].mxu0 }
 0x198   : > { %v586_v34 = vadd.f32 %v585_v29, %v426_v3  ;;  %v587_v35 = vpop.f32.mrb[7].mxu0  ;;  %v612_v42 = vmax.f32 %v582_v22, 0.0 }
 0x199   : > { %v619_v36 = vadd.f32 %v618_v19, %v584_v28  ;;  %v588_v37 = vadd.f32 %v587_v35, %v430_v5 }
 0x19a   : > { %v613_v43 = vmax.f32 %v586_v34, 0.0 }
 0x19b   : > { %v620_v44 = vadd.f32 %v619_v36, %v588_v37  ;;  %v1919_v36 = vld [vmem:[#allocation7 + $0x94] ss:$8 sps:$4 sm:$0xff]   ;;  %v1917_v37 = vld [vmem:[#allocation7 + $0x90] ss:$8 sps:$4 sm:$0xff]  }
 0x19c   : > { %v635_v45 = vpack.c.bf16 %v613_v43, %v612_v42  ;;  %v1922_v42 = vld [vmem:[#allocation7 + $0xa4] ss:$8 sps:$4 sm:$0xff]   ;;  %v1920_v43 = vld [vmem:[#allocation7 + $0xa0] ss:$8 sps:$4 sm:$0xff]  }
 0x19d   : > { %v591_v46 = vpop.f32.mrb[8].mxu0 }
 0x19e   : > { %v592_v47 = vadd.f32 %v591_v46, %v426_v3  ;;  %v593_v48 = vpop.f32.mrb[9].mxu0  ;;  %v1926_v46 = vld [vmem:[#allocation7 + $0xc0] ss:$8 sps:$4 sm:$0xff]  }
 0x19f   : > { %v594_v49 = vadd.f32 %v593_v48, %v430_v5  ;;  %v595_v50 = vpop.f32.mrb[10].mxu0  ;;  %v1929_v48 = vld [vmem:[#allocation7 + $0xd0] ss:$8 sps:$4 sm:$0xff]  }
 0x1a0   : > { %v596_v51 = vadd.f32 %v595_v50, %v426_v3  ;;  %v597_v52 = vpop.f32.mrb[11].mxu0  ;;  %v614_v55 = vmax.f32 %v592_v47, 0.0  ;;  %v1931_v47 = vld [vmem:[#allocation7 + $0xd4] ss:$8 sps:$4 sm:$0xff]   ;;  %v1932_v50 = vld [vmem:[#allocation7 + $0xe0] ss:$8 sps:$4 sm:$0xff]  }
 0x1a1   : > { %v621_v53 = vadd.f32 %v620_v44, %v594_v49  ;;  %v598_v54 = vadd.f32 %v597_v52, %v430_v5  ;;  %v1925_v44 = vld [vmem:[#allocation7 + $0xb4] ss:$8 sps:$4 sm:$0xff]   ;;  %v1934_v49 = vld [vmem:[#allocation7 + $0xe4] ss:$8 sps:$4 sm:$0xff]   ;;  %v1935_v52 = vld [vmem:[#allocation7 + $0xf0] ss:$8 sps:$4 sm:$0xff]  }
 0x1a2   : > { %v615_v56 = vmax.f32 %v596_v51, 0.0  ;;  %v1937_v51 = vld [vmem:[#allocation7 + $0xf4] ss:$8 sps:$4 sm:$0xff]  }
 0x1a3   : > { %v622_v57 = vadd.f32 %v621_v53, %v598_v54  ;;  %v1592_v54 = vld [vmem:[%s2737_s5] ss:$0 sm:$0xff] }
 0x1a4   : > { %v636_v58 = vpack.c.bf16 %v615_v56, %v614_v55 }
 0x1a5   : > { %v601_v59 = vpop.f32.mrb[12].mxu0 }
 0x1a6   : > { %v602_v60 = vadd.f32 %v601_v59, %v426_v3  ;;  %v603_v61 = vpop.f32.mrb[13].mxu0 }
 0x1a7   : > { %v604_v1 = vadd.f32 %v603_v61, %v430_v5  ;;  %v605_v4 = vpop.f32.mrb[14].mxu0 }
 0x1a8   : > { %v606_v6 = vadd.f32 %v605_v4, %v426_v3  ;;  %v607_v7 = vpop.f32.mrb[15].mxu0  ;;  %v616_v10 = vmax.f32 %v602_v60, 0.0  ;;  %v1916_v3 = vld [vmem:[#allocation7 + $0x84] ss:$8 sps:$4 sm:$0xff]  }
 0x1a9   : > { %v623_v8 = vadd.f32 %v622_v57, %v604_v1  ;;  %v608_v9 = vadd.f32 %v607_v7, %v430_v5  ;;  %v1914_v5 = vld [vmem:[#allocation7 + $0x80] ss:$8 sps:$4 sm:$0xff]   ;;  %1062 = vmatprep.subr.bf16.mxu0 %v1916_v3 }
 0x1aa   : > { %v617_v11 = vmax.f32 %v606_v6, 0.0  ;;  %1063 = vmatpush1.bf16.msra.mxu0 %v1914_v5 }
 0x1ab   : > { %v624_v12 = vadd.f32 %v623_v8, %v608_v9  ;;  %1064 = vmatprep.subr.bf16.mxu0 %v1919_v36 }
 0x1ac   : > { %v637_v13 = vpack.c.bf16 %v617_v11, %v616_v10 }
 0x1ad   : > { %v625_v14 = vrot.slane %v624_v12, 4 }
 0x1ae   : > { %1065 = vmatpush1.bf16.msra.mxu0 %v1917_v37 }
 0x1af   : > { %v626_v19 = vadd.f32 %v625_v14, %v624_v12  ;;  %1066 = vmatprep.subr.bf16.mxu0 %v1922_v42 }
 0x1b1   : > { %v627_v21 = vrot.slane %v626_v19, 2 }
 0x1b2   : > { %1067 = vmatpush1.bf16.msra.mxu0 %v1920_v43 }
 0x1b3   : > { %v628_v22 = vadd.f32 %v627_v21, %v626_v19  ;;  %1068 = vmatprep.subr.bf16.mxu0 %v1925_v44 }
 0x1b5   : > { %v629_v27 = vrot.slane %v628_v22, 1 }
 0x1b7   : > { %v630_v28 = vadd.f32 %v629_v27, %v628_v22 }
 0x1b9   : > { %v631_v29 = vmul.f32 0.015625, %v630_v28 }
 0x1bb   : > { %v632_v34 = vmax.f32 %v631_v29, 0.0 }
 0x1bd   : > { %v634_v35 = vpack.c.bf16 %v632_v34, %v632_v34 }
 0x1bf   : > { %772 = vmatprep.mubr.bf16.mxu1 %v634_v35 }
 0x1c0   : > { %773 = vmatmul.mubr.bf16.vlgmr.msra.gmra.mrb[0].mxu1 %v633_v20  ;;  %v1923_v20 = vld [vmem:[#allocation7 + $0xb0] ss:$8 sps:$4 sm:$0xff]  }
 0x1c1   : > { %780 = vmatprep.mubr.bf16.mxu1 %v634_v35  ;;  %1069 = vmatpush1.bf16.msra.mxu0 %v1923_v20 }
 0x1c8   : > { %781 = vmatmul.mubr.bf16.gmra.mrb[4].mxu1 %v635_v45  ;;  %v1928_v45 = vld [vmem:[#allocation7 + $0xc4] ss:$8 sps:$4 sm:$0xff]  }
 0x1c9   : > { %788 = vmatprep.mubr.bf16.mxu1 %v634_v35  ;;  %1070 = vmatprep.subr.bf16.mxu0 %v1928_v45 }
 0x1ca   : > { %1071 = vmatpush1.bf16.msra.mxu0 %v1926_v46 }
 0x1cb   : > { %1072 = vmatprep.subr.bf16.mxu0 %v1931_v47 }
 0x1ce   : > { %1073 = vmatpush1.bf16.msra.mxu0 %v1929_v48 }
 0x1cf   : > { %1074 = vmatprep.subr.bf16.mxu0 %v1934_v49 }
 0x1d0   : > { %789 = vmatmul.mubr.bf16.gmra.mrb[8].mxu1 %v636_v58 }
 0x1d1   : > { %796 = vmatprep.mubr.bf16.mxu1 %v634_v35 }
 0x1d2   : > { %1075 = vmatpush1.bf16.msra.mxu0 %v1932_v50 }
 0x1d3   : > { %1076 = vmatprep.subr.bf16.mxu0 %v1937_v51 }
 0x1d6   : > { %1077 = vmatpush1.bf16.msra.mxu0 %v1935_v52 }
 0x1d8   : > { %797 = vmatmul.mubr.bf16.gmra.mrb[12].mxu1 %v637_v13 }
 0x293   : > { %v1731_v53 = vpop.f32.mrb[0].mxu1 }
 0x294   : > { %v1732_v55 = vpop.f32.mrb[1].mxu1 }
 0x295   : > { %v1733_v56 = vadd.f32 %v1732_v55, %v1731_v53  ;;  %v1734_v57 = vpop.f32.mrb[2].mxu1 }
 0x296   : > { %v1735_v58 = vpop.f32.mrb[3].mxu1 }
 0x297   : > { %v775_v59 = vadd.f32 %v1733_v56, %v1592_v54  ;;  %v1736_v60 = vadd.f32 %v1735_v58, %v1734_v57 }
 0x299   : > { %v805_v61 = vsub.f32 0.0, %v775_v59  ;;  %v778_v1 = vadd.f32 %v1736_v60, %v1592_v54 }
 0x29b   : > { %v813_v4 = vmul.f32 1.442695, %v805_v61  ;;  %v806_v6 = vsub.f32 0.0, %v778_v1  ;;  %v1737_v7 = vpop.f32.mrb[4].mxu1 }
 0x29c   : > { %v1738_v8 = vpop.f32.mrb[5].mxu1 }
 0x29d   : > { %1954 = vpow2.f32 %v813_v4  ;;  %v815_v9 = vmul.f32 1.442695, %v806_v6  ;;  %v1739_v10 = vadd.f32 %v1738_v8, %v1737_v7  ;;  %v1740_v11 = vpop.f32.mrb[6].mxu1  ;;  %v2599_v6 = vsub.bf16 %v2516_v15, %v2522_v17 }
 0x29e   : > { %v1741_v12 = vpop.f32.mrb[7].mxu1 }
 0x29f   : > { %1956 = vpow2.f32 %v815_v9  ;;  %v783_v13 = vadd.f32 %v1739_v10, %v1592_v54  ;;  %v1742_v14 = vadd.f32 %v1741_v12, %v1740_v11  ;;  %v2603_v10 = vsub.bf16 %v2519_v16, %v2525_v18 }
 0x2a1   : > { %v807_v19 = vsub.f32 0.0, %v783_v13  ;;  %v786_v21 = vadd.f32 %v1742_v14, %v1592_v54 }
 0x2a3   : > { %v817_v22 = vmul.f32 1.442695, %v807_v19  ;;  %v808_v27 = vsub.f32 0.0, %v786_v21  ;;  %v1743_v28 = vpop.f32.mrb[8].mxu1 }
 0x2a4   : > { %v1744_v29 = vpop.f32.mrb[9].mxu1 }
 0x2a5   : > { %1958 = vpow2.f32 %v817_v22  ;;  %v819_v34 = vmul.f32 1.442695, %v808_v27  ;;  %v1745_v35 = vadd.f32 %v1744_v29, %v1743_v28  ;;  %v1746_v3 = vpop.f32.mrb[10].mxu1  ;;  %v2609_v28 = vsub.bf16 %v2532_v23, %v2538_v25 }
 0x2a6   : > { %v1747_v5 = vpop.f32.mrb[11].mxu1 }
 0x2a7   : > { %v1955_v36 = vpop.eup %1954  ;;  %1960 = vpow2.f32 %v819_v34  ;;  %v791_v37 = vadd.f32 %v1745_v35, %v1592_v54  ;;  %v1748_v42 = vadd.f32 %v1747_v5, %v1746_v3  ;;  %v2615_v35 = vsub.bf16 %v2535_v24, %v2541_v26 }
 0x2a8   : > { %v829_v43 = vadd.f32 1.0, %v1955_v36  ;;  %v2622_v24 = vsub.bf16 %v2549_v30, %v2555_v32 }
 0x2a9   : > { %v1957_v44 = vpop.eup %1956  ;;  %v809_v20 = vsub.f32 0.0, %v791_v37  ;;  %v794_v45 = vadd.f32 %v1748_v42, %v1592_v54 }
 0x2aa   : > { %1962 = vrcp.f32 %v829_v43  ;;  %v830_v46 = vadd.f32 1.0, %v1957_v44 }
 0x2ab   : > { %v821_v47 = vmul.f32 1.442695, %v809_v20  ;;  %v810_v48 = vsub.f32 0.0, %v794_v45  ;;  %v1749_v49 = vpop.f32.mrb[12].mxu1 }
 0x2ac   : > { %1964 = vrcp.f32 %v830_v46  ;;  %v1750_v50 = vpop.f32.mrb[13].mxu1 }
 0x2ad   : > { %1966 = vpow2.f32 %v821_v47  ;;  %v823_v51 = vmul.f32 1.442695, %v810_v48  ;;  %v1751_v52 = vadd.f32 %v1750_v50, %v1749_v49  ;;  %v1752_v53 = vpop.f32.mrb[14].mxu1  ;;  %v2628_v47 = vsub.bf16 %v2552_v31, %v2558_v33 }
 0x2ae   : > { %v1753_v55 = vpop.f32.mrb[15].mxu1 }
 0x2af   : > { %v1959_v56 = vpop.eup %1958  ;;  %1968 = vpow2.f32 %v823_v51  ;;  %v799_v57 = vadd.f32 %v1751_v52, %v1592_v54  ;;  %v1754_v58 = vadd.f32 %v1753_v55, %v1752_v53  ;;  %v2641_v55 = vsub.bf16 %v2569_v39, %v2575_v41  ;;  %v1939_v39 = vld [vmem:[#allocation8 + $0x80] sm:$0xff]  }
 0x2b0   : > { %v831_v59 = vadd.f32 1.0, %v1959_v56 }
 0x2b1   : > { %v1961_v60 = vpop.eup %1960  ;;  %v811_v61 = vsub.f32 0.0, %v799_v57  ;;  %v802_v1 = vadd.f32 %v1754_v58, %v1592_v54 }
 0x2b2   : > { %1970 = vrcp.f32 %v831_v59  ;;  %v832_v4 = vadd.f32 1.0, %v1961_v60 }
 0x2b3   : > { %v825_v7 = vmul.f32 1.442695, %v811_v61  ;;  %v812_v8 = vsub.f32 0.0, %v802_v1  ;;  %v1938_v1 = vld [vmem:[#allocation8 + $0xc0] sm:$0xff]  }
 0x2b4   : > { %v1963_v9 = vpop.eup %1962  ;;  %1972 = vrcp.f32 %v832_v4  ;;  %1755 = vmatprep.subr.bf16.mxu1 %v1938_v1  ;;  %v1940_v4 = vld [vmem:[#allocation8 + $0xc8] sm:$0xff]  }
 0x2b5   : > { %v1671_v11 = vpack.c.bf16 %v1963_v9, %v1963_v9  ;;  %1974 = vpow2.f32 %v825_v7  ;;  %v827_v12 = vmul.f32 1.442695, %v812_v8  ;;  %1756 = vmatpush3.bf16.msra.mxu1 %v1939_v39  ;;  %v1941_v7 = vld [vmem:[#allocation8 + $0x88] sm:$0xff]   ;;  %v1942_v8 = vld [vmem:[#allocation8 + $0xd0] sm:$0xff]  }
 0x2b6   : > { %v1965_v13 = vpop.eup %1964  ;;  %1757 = vmatprep.subr.bf16.mxu1 %v1940_v4  ;;  %v1943_v9 = vld [vmem:[#allocation8 + $0x90] sm:$0xff]  }
 0x2b7   : > { %v1967_v14 = vpop.eup %1966  ;;  %v877_v54 = vmul.bf16 %v1671_v11, %v2599_v6  ;;  %v1672_v19 = vpack.c.bf16 %v1965_v13, %v1965_v13  ;;  %1976 = vpow2.f32 %v827_v12  ;;  %v1945_v11 = vld [vmem:[#allocation8 + $0x98] sm:$0xff]   ;;  %v1946_v12 = vld [vmem:[#allocation8 + $0xe0] sm:$0xff]  }
 0x2b8   : > { %v833_v21 = vadd.f32 1.0, %v1967_v14  ;;  %v1947_v13 = vld [vmem:[#allocation8 + $0xa0] sm:$0xff]   ;;  %v1948_v14 = vld [vmem:[#allocation8 + $0xe8] sm:$0xff]  }
 0x2b9   : > { %v1969_v15 = vpop.eup %1968  ;;  %v878_v22 = vmul.bf16 %v1672_v19, %v2603_v10  ;;  %v885_v16 = vadd.bf16 %v877_v54, %v2522_v17  ;;  %1758 = vmatpush3.bf16.msra.mxu1 %v1941_v7  ;;  %v1949_v54 = vld [vmem:[#allocation8 + $0xa8] sm:$0xff]   ;;  %v1950_v19 = vld [vmem:[#allocation8 + $0xf0] sm:$0xff]  }
 0x2ba   : > { %1978 = vrcp.f32 %v833_v21  ;;  %v834_v27 = vadd.f32 1.0, %v1969_v15  ;;  %1759 = vmatprep.subr.bf16.mxu1 %v1942_v8  ;;  %v1951_v21 = vld [vmem:[#allocation8 + $0xb0] sm:$0xff]   ;;  %v1952_v15 = vld [vmem:[#allocation8 + $0xf8] sm:$0xff]  }
 0x2bb   : > { %v886_v29 = vadd.bf16 %v878_v22, %v2525_v18  ;;  %v1953_v22 = vld [vmem:[#allocation8 + $0xb8] sm:$0xff]  }
 0x2bc   : > { %v1971_v34 = vpop.eup %1970  ;;  %1980 = vrcp.f32 %v834_v27  ;;  %v1617_v27 = vld [vmem:[%s2735_s3 + $0x2] sm:$0x3] }
 0x2bd   : > { %v1619_v3 = vcombine.low %v885_v16, %v886_v29  ;;  %v1673_v5 = vpack.c.bf16 %v1971_v34, %v1971_v34  ;;  %1760 = vmatpush3.bf16.msra.mxu1 %v1943_v9  ;;  %v951_v16 = vrot.slane %v1617_v27, %v425_v63  ;;  %v955_v34 = vrot.slane %v1617_v27, %v429_v2 }
 0x2be   : > { %v1973_v36 = vpop.eup %1972 }
 0x2bf   : > { %v1975_v37 = vpop.eup %1974  ;;  %1095 = vmatmul.mubr.bf16.vlgmr.msra.gmra.mrb[16].mxu0 %v1619_v3  ;;  %v1674_v42 = vpack.c.bf16 %v1973_v36, %v1973_v36  ;;  %v879_v43 = vmul.bf16 %v1673_v5, %v2609_v28 }
 0x2c0   : > { %v835_v23 = vadd.f32 1.0, %v1975_v37  ;;  %1104 = vmatprep.mubr.bf16.mxu0 %v2228_v0 }
 0x2c1   : > { %v1977_v17 = vpop.eup %1976  ;;  %v880_v18 = vmul.bf16 %v1674_v42, %v2615_v35  ;;  %v887_v20 = vadd.bf16 %v879_v43, %v2538_v25  ;;  %v2635_v25 = vsub.bf16 %v2566_v38, %v2572_v40 }
 0x2c2   : > { %1982 = vrcp.f32 %v835_v23  ;;  %v836_v44 = vadd.f32 1.0, %v1977_v17 }
 0x2c3   : > { %v888_v45 = vadd.bf16 %v880_v18, %v2541_v26 }
 0x2c4   : > { %v1979_v46 = vpop.eup %1978  ;;  %1984 = vrcp.f32 %v836_v44 }
 0x2c5   : > { %v1620_v48 = vcombine.low %v887_v20, %v888_v45  ;;  %v1675_v49 = vpack.c.bf16 %v1979_v46, %v1979_v46 }
 0x2c6   : > { %v1981_v50 = vpop.eup %1980 }
 0x2c7   : > { %1105 = vmatmul.mubr.bf16.gmra.mrb[20].mxu0 %v1620_v48  ;;  %v1676_v51 = vpack.c.bf16 %v1981_v50, %v1981_v50  ;;  %v881_v52 = vmul.bf16 %v1675_v49, %v2622_v24 }
 0x2c8   : > { %1114 = vmatprep.mubr.bf16.mxu0 %v2228_v0 }
 0x2c9   : > { %v882_v30 = vmul.bf16 %v1676_v51, %v2628_v47  ;;  %v889_v26 = vadd.bf16 %v881_v52, %v2555_v32 }
 0x2cb   : > { %v890_v31 = vadd.bf16 %v882_v30, %v2558_v33 }
 0x2cc   : > { %v1983_v53 = vpop.eup %1982 }
 0x2cd   : > { %v1621_v56 = vcombine.low %v889_v26, %v890_v31  ;;  %v1677_v57 = vpack.c.bf16 %v1983_v53, %v1983_v53 }
 0x2ce   : > { %v1985_v58 = vpop.eup %1984 }
 0x2cf   : > { %1115 = vmatmul.mubr.bf16.gmra.mrb[24].mxu0 %v1621_v56  ;;  %v1678_v59 = vpack.c.bf16 %v1985_v58, %v1985_v58  ;;  %v883_v60 = vmul.bf16 %v1677_v57, %v2635_v25 }
 0x2d0   : > { %1124 = vmatprep.mubr.bf16.mxu0 %v2228_v0  ;;  %v1944_v0 = vld [vmem:[#allocation8 + $0xd8] sm:$0xff]  }
 0x2d1   : > { %v884_v38 = vmul.bf16 %v1678_v59, %v2641_v55  ;;  %v891_v32 = vadd.bf16 %v883_v60, %v2572_v40  ;;  %1761 = vmatprep.subr.bf16.mxu1 %v1944_v0 }
 0x2d2   : > { %1762 = vmatpush3.bf16.msra.mxu1 %v1945_v11 }
 0x2d3   : > { %v892_v33 = vadd.bf16 %v884_v38, %v2575_v41  ;;  %1763 = vmatprep.subr.bf16.mxu1 %v1946_v12 }
 0x2d5   : > { %v1622_v61 = vcombine.low %v891_v32, %v892_v33 }
 0x2d6   : > { %1764 = vmatpush3.bf16.msra.mxu1 %v1947_v13 }
 0x2d7   : > { %1125 = vmatmul.mubr.bf16.gmra.mrb[28].mxu0 %v1622_v61  ;;  %1765 = vmatprep.subr.bf16.mxu1 %v1948_v14 }
 0x2da   : > { %1766 = vmatpush3.bf16.msra.mxu1 %v1949_v54 }
 0x2db   : > { %1767 = vmatprep.subr.bf16.mxu1 %v1950_v19 }
 0x2de   : > { %1768 = vmatpush3.bf16.msra.mxu1 %v1951_v21 }
 0x2df   : > { %1769 = vmatprep.subr.bf16.mxu1 %v1952_v15 }
 0x2e2   : > { %1770 = vmatpush3.bf16.msra.mxu1 %v1953_v22 }
 0x392   : > { %v1096_v29 = vpop.f32.mrb[16].mxu0 }
 0x393   : > { %v1097_v3 = vadd.f32 %v1096_v29, %v951_v16  ;;  %v1098_v5 = vpop.f32.mrb[17].mxu0 }
 0x394   : > { %v1100_v36 = vpop.f32.mrb[18].mxu0  ;;  %v1099_v43 = vadd.f32 %v1098_v5, %v955_v34 }
 0x395   : > { %v1101_v37 = vadd.f32 %v1100_v36, %v951_v16  ;;  %v1102_v42 = vpop.f32.mrb[19].mxu0  ;;  %v1135_v17 = vmax.f32 %v1097_v3, 0.0 }
 0x396   : > { %v1103_v23 = vadd.f32 %v1102_v42, %v955_v34 }
 0x397   : > { %v1136_v18 = vmax.f32 %v1101_v37, 0.0 }
 0x398   : > { %v1143_v44 = vadd.f32 %v1103_v23, %v1099_v43 }
 0x399   : > { %v1158_v20 = vpack.c.bf16 %v1136_v18, %v1135_v17 }
 0x39a   : > { %v1106_v45 = vpop.f32.mrb[20].mxu0 }
 0x39b   : > { %v1107_v46 = vadd.f32 %v1106_v45, %v951_v16  ;;  %v1108_v48 = vpop.f32.mrb[21].mxu0 }
 0x39c   : > { %v1109_v49 = vadd.f32 %v1108_v48, %v955_v34  ;;  %v1110_v63 = vpop.f32.mrb[22].mxu0 }
 0x39d   : > { %v1111_v50 = vadd.f32 %v1110_v63, %v951_v16  ;;  %v1112_v51 = vpop.f32.mrb[23].mxu0  ;;  %v1137_v52 = vmax.f32 %v1107_v46, 0.0 }
 0x39e   : > { %v1144_v62 = vadd.f32 %v1143_v44, %v1109_v49  ;;  %v1113_v2 = vadd.f32 %v1112_v51, %v955_v34 }
 0x39f   : > { %v1138_v30 = vmax.f32 %v1111_v50, 0.0 }
 0x3a0   : > { %v1145_v26 = vadd.f32 %v1144_v62, %v1113_v2 }
 0x3a1   : > { %v1160_v31 = vpack.c.bf16 %v1138_v30, %v1137_v52 }
 0x3a2   : > { %v1116_v53 = vpop.f32.mrb[24].mxu0 }
 0x3a3   : > { %v1117_v56 = vadd.f32 %v1116_v53, %v951_v16  ;;  %v1118_v57 = vpop.f32.mrb[25].mxu0 }
 0x3a4   : > { %v1119_v58 = vadd.f32 %v1118_v57, %v955_v34  ;;  %v1120_v59 = vpop.f32.mrb[26].mxu0 }
 0x3a5   : > { %v1121_v60 = vadd.f32 %v1120_v59, %v951_v16  ;;  %v1122_v38 = vpop.f32.mrb[27].mxu0  ;;  %v1139_v61 = vmax.f32 %v1117_v56, 0.0 }
 0x3a6   : > { %v1146_v32 = vadd.f32 %v1145_v26, %v1119_v58  ;;  %v1123_v33 = vadd.f32 %v1122_v38, %v955_v34 }
 0x3a7   : > { %v1140_v1 = vmax.f32 %v1121_v60, 0.0 }
 0x3a8   : > { %v1147_v39 = vadd.f32 %v1146_v32, %v1123_v33 }
 0x3a9   : > { %v1161_v4 = vpack.c.bf16 %v1140_v1, %v1139_v61 }
 0x3aa   : > { %v1126_v7 = vpop.f32.mrb[28].mxu0 }
 0x3ab   : > { %v1127_v8 = vadd.f32 %v1126_v7, %v951_v16  ;;  %v1128_v9 = vpop.f32.mrb[29].mxu0 }
 0x3ac   : > { %v1129_v0 = vadd.f32 %v1128_v9, %v955_v34  ;;  %v1130_v11 = vpop.f32.mrb[30].mxu0 }
 0x3ad   : > { %v1131_v12 = vadd.f32 %v1130_v11, %v951_v16  ;;  %v1132_v13 = vpop.f32.mrb[31].mxu0  ;;  %v1141_v19 = vmax.f32 %v1127_v8, 0.0 }
 0x3ae   : > { %v1148_v14 = vadd.f32 %v1147_v39, %v1129_v0  ;;  %v1133_v54 = vadd.f32 %v1132_v13, %v955_v34  ;;  %v1639_v34 = vld [vmem:[%s2737_s5 + $0x1] ss:$0 sm:$0xff] }
 0x3af   : > { %v1142_v21 = vmax.f32 %v1131_v12, 0.0 }
 0x3b0   : > { %v1149_v15 = vadd.f32 %v1148_v14, %v1133_v54 }
 0x3b1   : > { %v1162_v22 = vpack.c.bf16 %v1142_v21, %v1141_v19 }
 0x3b2   : > { %v1150_v27 = vrot.slane %v1149_v15, 4 }
 0x3b4   : > { %v1151_v29 = vadd.f32 %v1150_v27, %v1149_v15 }
 0x3b6   : > { %v1152_v3 = vrot.slane %v1151_v29, 2 }
 0x3b8   : > { %v1153_v5 = vadd.f32 %v1152_v3, %v1151_v29 }
 0x3ba   : > { %v1154_v36 = vrot.slane %v1153_v5, 1 }
 0x3bc   : > { %v1155_v37 = vadd.f32 %v1154_v36, %v1153_v5 }
 0x3be   : > { %v1156_v42 = vmul.f32 0.015625, %v1155_v37 }
 0x3c0   : > { %v1157_v43 = vmax.f32 %v1156_v42, 0.0 }
 0x3c2   : > { %v1159_v23 = vpack.c.bf16 %v1157_v43, %v1157_v43 }
 0x3c4   : > { %1297 = vmatprep.mubr.bf16.mxu1 %v1159_v23 }
 0x3c5   : > { %1298 = vmatmul.mubr.bf16.vlgmr.msra.gmra.mrb[16].mxu1 %v1158_v20 }
 0x3c6   : > { %1305 = vmatprep.mubr.bf16.mxu1 %v1159_v23 }
 0x3cd   : > { %1306 = vmatmul.mubr.bf16.gmra.mrb[20].mxu1 %v1160_v31 }
 0x3ce   : > { %1313 = vmatprep.mubr.bf16.mxu1 %v1159_v23 }
 0x3d5   : > { %1314 = vmatmul.mubr.bf16.gmra.mrb[24].mxu1 %v1161_v4 }
 0x3d6   : > { %1321 = vmatprep.mubr.bf16.mxu1 %v1159_v23 }
 0x3dd   : > { %1322 = vmatmul.mubr.bf16.gmra.mrb[28].mxu1 %v1162_v22 }
 0x498   : > { %v1771_v16 = vpop.f32.mrb[16].mxu1 }
 0x499   : > { %v1772_v17 = vpop.f32.mrb[17].mxu1 }
 0x49a   : > { %v1773_v18 = vadd.f32 %v1772_v17, %v1771_v16  ;;  %v1774_v44 = vpop.f32.mrb[18].mxu1 }
 0x49b   : > { %v1775_v45 = vpop.f32.mrb[19].mxu1 }
 0x49c   : > { %v1300_v46 = vadd.f32 %v1773_v18, %v1639_v34  ;;  %v1776_v48 = vadd.f32 %v1775_v45, %v1774_v44 }
 0x49e   : > { %v1330_v49 = vsub.f32 0.0, %v1300_v46  ;;  %v1303_v63 = vadd.f32 %v1776_v48, %v1639_v34 }
 0x4a0   : > { %v1338_v20 = vmul.f32 1.442695, %v1330_v49  ;;  %v1331_v50 = vsub.f32 0.0, %v1303_v63  ;;  %v1777_v51 = vpop.f32.mrb[20].mxu1 }
 0x4a1   : > { %v1778_v62 = vpop.f32.mrb[21].mxu1 }
 0x4a2   : > { %1986 = vpow2.f32 %v1338_v20  ;;  %v1340_v2 = vmul.f32 1.442695, %v1331_v50  ;;  %v1779_v52 = vadd.f32 %v1778_v62, %v1777_v51  ;;  %v1780_v30 = vpop.f32.mrb[22].mxu1  ;;  %v2018_v62 = vld [vmem:[%s2500_s14] sm:$0xf] }
 0x4a3   : > { %v1781_v26 = vpop.f32.mrb[23].mxu1 }
 0x4a4   : > { %1988 = vpow2.f32 %v1340_v2  ;;  %v1308_v31 = vadd.f32 %v1779_v52, %v1639_v34  ;;  %v1782_v53 = vadd.f32 %v1781_v26, %v1780_v30  ;;  %v2019_v52 = vld [vmem:[%s2500_s14 + $0x4] sm:$0xf] }
 0x4a6   : > { %v1332_v56 = vsub.f32 0.0, %v1308_v31  ;;  %v1311_v57 = vadd.f32 %v1782_v53, %v1639_v34 }
 0x4a8   : > { %v1342_v58 = vmul.f32 1.442695, %v1332_v56  ;;  %v1333_v59 = vsub.f32 0.0, %v1311_v57  ;;  %v1783_v60 = vpop.f32.mrb[24].mxu1 }
 0x4a9   : > { %v1784_v38 = vpop.f32.mrb[25].mxu1 }
 0x4aa   : > { %1990 = vpow2.f32 %v1342_v58  ;;  %v1344_v32 = vmul.f32 1.442695, %v1333_v59  ;;  %v1785_v33 = vadd.f32 %v1784_v38, %v1783_v60  ;;  %v1786_v61 = vpop.f32.mrb[26].mxu1 }
 0x4ab   : > { %v1787_v1 = vpop.f32.mrb[27].mxu1 }
 0x4ac   : > { %v1987_v39 = vpop.eup %1986  ;;  %1992 = vpow2.f32 %v1344_v32  ;;  %v1316_v4 = vadd.f32 %v1785_v33, %v1639_v34  ;;  %v1788_v7 = vadd.f32 %v1787_v1, %v1786_v61  ;;  %v2020_v32 = vld [vmem:[%s2500_s14 + $0x8] sm:$0xf]  ;;  %v2021_v61 = vld [vmem:[%s2500_s14 + $0xc] sm:$0xf] }
 0x4ad   : > { %v1354_v8 = vadd.f32 1.0, %v1987_v39 }
 0x4ae   : > { %v1989_v9 = vpop.eup %1988  ;;  %v1334_v0 = vsub.f32 0.0, %v1316_v4  ;;  %v1319_v11 = vadd.f32 %v1788_v7, %v1639_v34 }
 0x4af   : > { %1994 = vrcp.f32 %v1354_v8  ;;  %v1355_v12 = vadd.f32 1.0, %v1989_v9 }
 0x4b0   : > { %v1346_v13 = vmul.f32 1.442695, %v1334_v0  ;;  %v1335_v14 = vsub.f32 0.0, %v1319_v11  ;;  %v1789_v54 = vpop.f32.mrb[28].mxu1  ;;  %v2022_v0 = vld [vmem:[%s2500_s14 + $0x10] sm:$0xf] }
 0x4b1   : > { %1996 = vrcp.f32 %v1355_v12  ;;  %v1790_v19 = vpop.f32.mrb[29].mxu1  ;;  %v2023_v12 = vld [vmem:[%s2500_s14 + $0x14] sm:$0xf]  ;;  %s2144_s14 = sshll.u32 %s2229_s25, 4  ;;  %s2145_s14 = int_to_ptr.vmem [resolvable:$false] %s2144_s14 }
 0x4b2   : > { %1998 = vpow2.f32 %v1346_v13  ;;  %v1348_v21 = vmul.f32 1.442695, %v1335_v14  ;;  %v1791_v15 = vadd.f32 %v1790_v19, %v1789_v54  ;;  %v1792_v22 = vpop.f32.mrb[30].mxu1  ;;  %s2146_s27 = scalar_lea.vmem %s2145_s14, 1024  ;;  %p2147_p4 = scmp.lt.s32.totalorder %s2687_s0, %s2145_s14 }
 0x4b3   : > { %v1793_v27 = vpop.f32.mrb[31].mxu1  ;;  %p2148_p7 = scmp.lt.s32.totalorder %s2146_s27, %s2140_s17 }
 0x4b4   : > { %v1991_v29 = vpop.eup %1990  ;;  %2000 = vpow2.f32 %v1348_v21  ;;  %v1324_v3 = vadd.f32 %v1791_v15, %v1639_v34  ;;  %v1794_v5 = vadd.f32 %v1793_v27, %v1792_v22 }
 0x4b5   : > { %v1356_v36 = vadd.f32 1.0, %v1991_v29  ;;  %p2149_p3 = por %p2148_p7, %p2147_p4 }
 0x4b6   : > { %v1993_v37 = vpop.eup %1992  ;;  %v1336_v42 = vsub.f32 0.0, %v1324_v3  ;;  %v1327_v43 = vadd.f32 %v1794_v5, %v1639_v34 }
 0x4b7   : > { %2002 = vrcp.f32 %v1356_v36  ;;  %v1357_v23 = vadd.f32 1.0, %v1993_v37  ;;  %p2150_p5 = pnand %p2149_p3, %p2143_p10 }
 0x4b8   : > { %v1350_v16 = vmul.f32 1.442695, %v1336_v42  ;;  %v1337_v17 = vsub.f32 0.0, %v1327_v43 }
 0x4b9   : > { %v1995_v18 = vpop.eup %1994  ;;  %2004 = vrcp.f32 %v1357_v23 }
 0x4ba   : > { %v1679_v44 = vpack.c.bf16 %v1995_v18, %v1995_v18  ;;  %2006 = vpow2.f32 %v1350_v16  ;;  %v1352_v45 = vmul.f32 1.442695, %v1337_v17 }
 0x4bb   : > { %v1997_v46 = vpop.eup %1996 }
 0x4bc   : > { %v1999_v48 = vpop.eup %1998  ;;  %v1402_v49 = vmul.bf16 %v1679_v44, %v2599_v6  ;;  %v1680_v63 = vpack.c.bf16 %v1997_v46, %v1997_v46  ;;  %2008 = vpow2.f32 %v1352_v45 }
 0x4bd   : > { %v1358_v20 = vadd.f32 1.0, %v1999_v48 }
 0x4be   : > { %v2001_v34 = vpop.eup %2000  ;;  %v1403_v50 = vmul.bf16 %v1680_v63, %v2603_v10  ;;  %v1410_v2 = vadd.bf16 %v2018_v62, %v1402_v49 }
 0x4bf   : > { %2010 = vrcp.f32 %v1358_v20  ;;  %v1359_v51 = vadd.f32 1.0, %v2001_v34 }
 0x4c0   : > { %v1411_v30 = vadd.bf16 %v2019_v52, %v1403_v50 }
 0x4c1   : > { %v2003_v26 = vpop.eup %2002  ;;  %2012 = vrcp.f32 %v1359_v51 }
 0x4c2   : > { %v1708_v31 = vcombine.low %v1410_v2, %v1411_v30  ;;  %v1681_v53 = vpack.c.bf16 %v2003_v26, %v2003_v26 }
 0x4c3   : > { %v2005_v6 = vpop.eup %2004 }
 0x4c4   : > { %v2007_v56 = vpop.eup %2006  ;;  %1692 = vst [vmem:[%s2663_s16] sm:$0xff] %v1708_v31   ;;  %v1404_v10 = vmul.bf16 %v1681_v53, %v2609_v28  ;;  %v1682_v57 = vpack.c.bf16 %v2005_v6, %v2005_v6 }
 0x4c5   : > { %v1360_v58 = vadd.f32 1.0, %v2007_v56 }
 0x4c6   : > { %v2009_v59 = vpop.eup %2008  ;;  %v1405_v60 = vmul.bf16 %v1682_v57, %v2615_v35  ;;  %v1412_v33 = vadd.bf16 %v2020_v32, %v1404_v10 }
 0x4c7   : > { %2014 = vrcp.f32 %v1360_v58  ;;  %v1361_v38 = vadd.f32 1.0, %v2009_v59 }
 0x4c8   : > { %v1413_v1 = vadd.bf16 %v2021_v61, %v1405_v60 }
 0x4c9   : > { %v2011_v39 = vpop.eup %2010  ;;  %2016 = vrcp.f32 %v1361_v38 }
 0x4ca   : > { %v1709_v4 = vcombine.low %v1412_v33, %v1413_v1  ;;  %v1683_v7 = vpack.c.bf16 %v2011_v39, %v2011_v39 }
 0x4cb   : > { %v2013_v28 = vpop.eup %2012 }
 0x4cc   : > { %1710 = vst [vmem:[%s2663_s16 + $0x8] sm:$0xff] %v1709_v4   ;;  %v1406_v8 = vmul.bf16 %v1683_v7, %v2622_v24  ;;  %v1684_v35 = vpack.c.bf16 %v2013_v28, %v2013_v28 }
 0x4ce   : > { %v1407_v9 = vmul.bf16 %v1684_v35, %v2628_v47  ;;  %v1414_v11 = vadd.bf16 %v2022_v0, %v1406_v8 }
 0x4d0   : > { %v1415_v13 = vadd.bf16 %v2023_v12, %v1407_v9 }
 0x4d1   : > { %v2015_v14 = vpop.eup %2014 }
 0x4d2   : > { %v1711_v54 = vcombine.low %v1414_v11, %v1415_v13  ;;  %v1685_v19 = vpack.c.bf16 %v2015_v14, %v2015_v14 }
 0x4d3   : > { %v2017_v21 = vpop.eup %2016 }
 0x4d4   : > { %1712 = vst [vmem:[%s2663_s16 + $0x10] sm:$0xff] %v1711_v54   ;;  %v1408_v15 = vmul.bf16 %v1685_v19, %v2635_v25  ;;  %v1686_v22 = vpack.c.bf16 %v2017_v21, %v2017_v21 }
 0x4d6   : > { %v1409_v24 = vmul.bf16 %v1686_v22, %v2641_v55  ;;  %v1416_v47 = vadd.bf16 %v1408_v15, %v2572_v40 }
 0x4d8   : > { %v1417_v27 = vadd.bf16 %v1409_v24, %v2575_v41 }
 0x4da   : > { %v1713_v25 = vcombine.low %v1416_v47, %v1417_v27 }
 0x4dc   : > { %1714 = vst [vmem:[%s2663_s16 + $0x18] sm:$0xff] %v1713_v25  }
 0x4dd   : > { %2153 = shalt.err (!%p2150_p5)
}
 0x4de   : > { %s2154_s15 = scalar_lea.hbm %s2685_s12, 512  ;;  %s2158_s2 = scalar_lea.hbm %s2738_s6, 1024 }
 0x4df   : > { %p2155_p9 = scmp.ne.s32.totalorder %s2685_s12, %s2154_s15  ;;  %p2159_p11 = scmp.lt.u32.totalorder %s2685_s12, %s2738_s6 }
 0x4e0   : > { %p2160_p1 = scmp.lt.u32.totalorder %s2158_s2, %s2154_s15  ;;  %p2162_p2 = scmp.lt.u32.totalorder %s2154_s15, %s2685_s12 }
 0x4e1   : > { %p2156_p0 = pnand %p2155_p9, %p2766_p13 }
 0x4e2   : > { %p2161_p12 = por %p2160_p1, %p2159_p11 }
 0x4e3   : > { %p2157_p8 = pneg %p2156_p0 }
 0x4e4   : > { %p2163_p6 = por %p2162_p2, %p2161_p12 }
 0x4e6   : > { %p2164_p10 = pnand %p2163_p6, %p2157_p8 }
 0x4e8   : > { %2167 = shalt.err (!%p2164_p10)
}
 0x4e9   : > { %s2230_s18 = smov 64   ;;  %s2231_s16 = smov 4  }
 0x4ea   : > { %1807 = dma.vmem_to_hbm [thread:$0]  (%p2766_p13), %s2687_s0, 512, %s2685_s12, %s1427_s29, %s2230_s18, %s2230_s18, %s2231_s16  }
 0x4eb PF: > { %s1455_s19 = sand.u32 1, %s2206_s21   ;;  %p2767_p4 = scmp.ne.s32.totalorder %s2750_s28, 0 }
 0x4ec   : > { %p2768_p7 = scmp.ge.s32.totalorder %s2218_s24, 2  ;;  %s1456_s10 = scalar_lea.sflag [#allocation4], %s1455_s19 }
 0x4ee   : > { %p1824_p3 = pnand %p2768_p7, %p2767_p4 }
 0x4f0   : > { %2201 = dma.done.wait (!%p1824_p3), %s1456_s10, 512  }
 0x4f1   : > { %2203 = vsyncadd (!%p1824_p3), %s1456_s10, 4294966784  ;;  %p23_p5 = scmp.ge.s32.totalorder %s2380_s26, 4   ;;  %s2769_s21 = smov %s2210_s22 }
 0x4f2   : > { %s2770_s22 = smov %s2214_s23  ;;  %s2771_s23 = smov %s2389_s11 }
 0x4f3   : > { %s2772_s24 = smov %s2380_s26  ;;  %25 = sbr.rel (!%p23_p5) target bundleno = 12 (0xc), region = 114 }
 0x4fa   :  { %1461 = vsyncpa [#allocation3], 1 }
 0x4fb   :  { %1463 = vsyncpa [#allocation3 + $0x1], 1 }
 0x4fc   :  { %1464 = vsyncpa [#allocation6], 1 }
 0x4fd   :  { %1466 = vsyncpa [#allocation6 + $0x1], 1 }
 0x4fe   :  { %1467 = vsyncpa [#allocation9], 1 }
 0x4ff   :  { %1468 = vsyncpa [#allocation4], 1 }
 0x500   :  { %1470 = vsyncpa [#allocation4 + $0x1], 1 }

</bundles_post_ra>
